<compile_context>
chip_gen: v6e
topology: v6e:2x2x1
jax: 0.10.0
libtpu: 0.0.40
codegen_flags: <defaults>
</compile_context>

<pallas_src>
import functools

import jax
import jax.numpy as jnp
from jax.experimental import pallas as pl
from jax.experimental.pallas import tpu as pltpu


def _vmem_capacity_bytes():
    """Best-effort per-core VMEM capacity query with a conservative fallback."""
    try:
        info = pltpu.get_tpu_info()
        cap = getattr(info, "vmem_capacity_bytes", None)
        if cap:
            return int(cap)
    except Exception:
        pass
    return 64 * 1024 * 1024  # v7x per-TC VMEM (smallest current generation)


def _num_tensorcores():
    """Best-effort TensorCores-per-chip query (used only to gate the N==1
    spatial core-split). Falls back to 1 (split disabled) when unknown."""
    try:
        info = pltpu.get_tpu_info()
        for attr in ("num_cores", "core_count", "num_tensorcores",
                     "tensorcores_per_chip", "cores_per_chip"):
            v = getattr(info, attr, None)
            if v:
                return int(v)
    except Exception:
        pass
    try:
        kind = jax.devices()[0].device_kind.lower()
        if any(tag in kind for tag in ("v7", "7x", "v4", "v5p")):
            return 2
    except Exception:
        pass
    return 1


def _accum_block(x_ref, acc_ref, n_valid, acc_w):
    """Add the first `n_valid` lanes of the (1, C, ts) block into the
    (1, C, acc_w) f32 accumulator.  All quantities are Python-static, so the
    invalid (boundary-padded) lanes of a ragged tail are masked at zero cost
    beyond a couple of VPU ops."""
    full = n_valid // acc_w
    for c in range(full):                       # <= 32 unrolled chunk adds
        acc_ref[...] += x_ref[:, :, c * acc_w:(c + 1) * acc_w].astype(jnp.float32)
    base = full * acc_w
    rem = n_valid - base
    if rem:
        rem128 = (rem // 128) * 128
        if rem128:
            acc_ref[:, :, :rem128] += (
                x_ref[:, :, base:base + rem128].astype(jnp.float32))
        tail = rem - rem128
        if tail:
            # Partial 128-lane slab: mask garbage lanes BEFORE accumulating.
            slab = x_ref[:, :, base + rem128:base + rem128 + 128].astype(jnp.float32)
            lane = jax.lax.broadcasted_iota(jnp.int32, slab.shape, 2)
            acc_ref[:, :, :128] += jnp.where(lane < tail, slab, 0.0)


def _chattn_fused_kernel(x_ref, w1t_ref, b1_ref, w2t_ref, b2_ref, o_ref, acc_ref,
                         *, inv_spatial, ts, acc_w, tail_valid):
    # Grid = (N, n_steps); axis 0 parallel (per-sample), axis 1 spatial reduce.
    s = pl.program_id(1)
    last = pl.num_programs(1) - 1

    @pl.when(s == 0)
    def _():
        acc_ref[...] = jnp.zeros_like(acc_ref)

    if tail_valid == ts:
        _accum_block(x_ref, acc_ref, ts, acc_w)
    else:
        @pl.when(s < last)
        def _():
            _accum_block(x_ref, acc_ref, ts, acc_w)

        @pl.when(s == last)
        def _():
            _accum_block(x_ref, acc_ref, tail_valid, acc_w)

    # Last chunk: finish the mean (single XLU lane-reduce), run the 1x1x1-conv
    # MLP + gates on the MXU, write the (1, 1, C) output row.
    @pl.when(s == last)
    def _():
        pooled = jnp.sum(acc_ref[...], axis=-1) * inv_spatial          # (1, C)
        h = jnp.dot(pooled, w1t_ref[...],
                    preferred_element_type=jnp.float32) + b1_ref[...]
        h = h * jax.nn.sigmoid(h)                                      # SiLU
        y = jnp.dot(h, w2t_ref[...],
                    preferred_element_type=jnp.float32) + b2_ref[...]
        o_ref[...] = jax.nn.sigmoid(y).reshape(o_ref.shape).astype(o_ref.dtype)


def _chattn_split_kernel(x_ref, o_ref, acc_ref,
                         *, ts, acc_w, tail_valid, n_steps, steps_per_part, n_parts):
    # Grid = (N, G, steps_per_part); axes 0/1 parallel, axis 2 spatial reduce.
    g = pl.program_id(1)
    s = pl.program_id(2)
    gstep = g * steps_per_part + s          # global spatial step (may overrun)

    @pl.when(s == 0)
    def _():
        acc_ref[...] = jnp.zeros_like(acc_ref)

    if tail_valid == ts:
        @pl.when(gstep < n_steps)
        def _():
            _accum_block(x_ref, acc_ref, ts, acc_w)
    else:
        @pl.when(gstep < n_steps - 1)
        def _():
            _accum_block(x_ref, acc_ref, ts, acc_w)

        @pl.when(gstep == n_steps - 1)
        def _():
            _accum_block(x_ref, acc_ref, tail_valid, acc_w)

    # Per-part partial sum (un-normalised); the tiny MLP epilogue runs in the
    # wrapper so the two cores never need to synchronise.
    @pl.when(s == steps_per_part - 1)
    def _():
        o_ref[...] = jnp.sum(acc_ref[...], axis=-1).reshape(o_ref.shape)


def chattn_block(x, w1, b1, w2, b2, *, split_spatial=None, max_block_lanes=None):
    """x: (N, C, D, H, W); w1, w2: (C, C) (Conv3d 1x1x1 kernels squeezed);
    b1, b2: (C,).  Returns (N, C, 1, 1, 1)."""
    N, C, D, H, W = x.shape
    S = D * H * W
    x_flat = x.reshape(N, C, S)                # native dtype, no upcast, no pad
    itemsize = x.dtype.itemsize

    # ---- auto-size the spatial tile from the per-generation VMEM budget ----
    vmem_cap = _vmem_capacity_bytes()
    x_budget = min(vmem_cap // 2, 48 << 20)    # for the double-buffered x blocks
    block_bytes = min(8 << 20, x_budget // 2)  # target ~8 MiB DMA blocks
    ts_cap = (block_bytes // (C * itemsize)) // 128 * 128
    ts_cap = max(128, min(ts_cap, 32768))      # <= 32 chunk-adds per step
    if max_block_lanes is not None:
        ts_cap = max(128, min(ts_cap, (max_block_lanes // 128) * 128))

    s128 = -(-S // 128) * 128                  # S rounded up to the lane tile
    ts = min(ts_cap, s128)                     # multiple of 128
    n_steps = pl.cdiv(S, ts)
    tail_valid = S - (n_steps - 1) * ts        # 1 <= tail_valid <= ts (static)
    acc_w = min(1024, ts)                      # wide lane-dense accumulator

    # Pre-transpose weights so the kernel does pooled @ W^T on the MXU.
    w1t = jnp.transpose(w1).astype(jnp.float32)        # (C_in, C_out)
    w2t = jnp.transpose(w2).astype(jnp.float32)
    b1r = b1.reshape(1, C).astype(jnp.float32)
    b2r = b2.reshape(1, C).astype(jnp.float32)

    # VMEM limit: double-buffered x block + double-buffered weights + scratch
    # + headroom, never above 3/4 of physical VMEM (tight on v7x).
    vmem_needed = (2 * C * ts * itemsize + 4 * (C * C + C) * 4
                   + C * acc_w * 4 + (4 << 20))
    vmem_limit = int(min(max(vmem_needed, 32 << 20), vmem_cap * 3 // 4))

    if split_spatial is None:
        split_spatial = (N == 1 and n_steps >= 2 and _num_tensorcores() >= 2)
    split_spatial = bool(split_spatial) and n_steps >= 2

    if not split_spatial:
        # ---------------- fused path: in-kernel MLP epilogue ----------------
        cost = pl.CostEstimate(
            flops=N * C * S + 4 * N * C * C,
            transcendentals=3 * N * C,
            bytes_accessed=(N * C * S * itemsize + 2 * C * (C + 1) * 4
                            + N * C * itemsize))
        out = pl.pallas_call(
            functools.partial(_chattn_fused_kernel, inv_spatial=1.0 / S, ts=ts,
                              acc_w=acc_w, tail_valid=tail_valid),
            out_shape=jax.ShapeDtypeStruct((N, 1, C), x.dtype),
            grid_spec=pltpu.PrefetchScalarGridSpec(
                num_scalar_prefetch=0,
                grid=(N, n_steps),
                in_specs=[
                    pl.BlockSpec((1, C, ts), lambda n, s: (n, 0, s)),   # x chunk
                    pl.BlockSpec((C, C), lambda n, s: (0, 0)),          # w1^T
                    pl.BlockSpec((1, C), lambda n, s: (0, 0)),          # b1
                    pl.BlockSpec((C, C), lambda n, s: (0, 0)),          # w2^T
                    pl.BlockSpec((1, C), lambda n, s: (0, 0)),          # b2
                ],
                out_specs=pl.BlockSpec((1, 1, C), lambda n, s: (n, 0, 0)),
                scratch_shapes=[pltpu.VMEM((1, C, acc_w), jnp.float32)]),
            compiler_params=pltpu.CompilerParams(
                dimension_semantics=("parallel", "arbitrary"),
                vmem_limit_bytes=vmem_limit),
            cost_estimate=cost,
        )(x_flat, w1t, b1r, w2t, b2r)
        return out.reshape(N, C, 1, 1, 1)

    # -------- split path: spatial reduction split across TensorCores --------
    G = 2
    spp = pl.cdiv(n_steps, G)                  # steps per part (static)
    cost = pl.CostEstimate(
        flops=N * C * S,
        transcendentals=0,
        bytes_accessed=N * C * S * itemsize + N * G * C * 4)
    partial = pl.pallas_call(
        functools.partial(_chattn_split_kernel, ts=ts, acc_w=acc_w,
                          tail_valid=tail_valid, n_steps=n_steps,
                          steps_per_part=spp, n_parts=G),
        out_shape=jax.ShapeDtypeStruct((N * G, 1, C), jnp.float32),
        grid_spec=pltpu.PrefetchScalarGridSpec(
            num_scalar_prefetch=0,
            grid=(N, G, spp),
            in_specs=[pl.BlockSpec(
                (1, C, ts),
                # clamp the block index so overrun steps never DMA OOB; the
                # kernel statically skips their contribution.
                lambda n, g, s: (n, 0, jnp.minimum(g * spp + s, n_steps - 1)))],
            out_specs=pl.BlockSpec((1, 1, C), lambda n, g, s: (n * G + g, 0, 0)),
            scratch_shapes=[pltpu.VMEM((1, C, acc_w), jnp.float32)]),
        compiler_params=pltpu.CompilerParams(
            dimension_semantics=("parallel", "parallel", "arbitrary"),
            vmem_limit_bytes=vmem_limit),
        cost_estimate=cost,
    )(x_flat)

    # Tiny epilogue on (N, C): combine per-core partials, mean, channel MLP.
    pooled = partial.reshape(N, G, C).sum(axis=1) * (1.0 / S)
    h = pooled @ w1t + b1r
    h = h * jax.nn.sigmoid(h)
    y = h @ w2t + b2r
    out = jax.nn.sigmoid(y).astype(x.dtype)
    return out.reshape(N, C, 1, 1, 1)


def _reference(x, w1, b1, w2, b2):
    # Pure-JAX reference of the PyTorch module.
    pooled = jnp.mean(x.astype(jnp.float32), axis=(2, 3, 4))      # (N, C)
    h = pooled @ w1.T + b1
    h = h * jax.nn.sigmoid(h)
    y = h @ w2.T + b2
    return jax.nn.sigmoid(y)[:, :, None, None, None]


if __name__ == "__main__":
    dim = 64                                   # matches CHattnblock(dim=64)

    key = jax.random.PRNGKey(0)
    kx, kw1, kb1, kw2, kb2, kx2 = jax.random.split(key, 6)

    # Conv3d(dim, dim, 1) weights have shape (dim, dim, 1, 1, 1); squeeze to (dim, dim).
    w1 = jax.random.normal(kw1, (dim, dim), dtype=jnp.float32) * 0.05
    b1 = jax.random.normal(kb1, (dim,), dtype=jnp.float32) * 0.05
    w2 = jax.random.normal(kw2, (dim, dim), dtype=jnp.float32) * 0.05
    b2 = jax.random.normal(kb2, (dim,), dtype=jnp.float32) * 0.05

    # Config A: fused-epilogue path; multi-step spatial reduction (ts forced
    # to 2048) with a ragged 128-lane tail -> exercises all mask branches.
    xa = jax.random.normal(kx, (2, dim, 4, 8, 89), dtype=jnp.float32)   # S=2848
    out_a = jax.block_until_ready(
        chattn_block(xa, w1, b1, w2, b2, max_block_lanes=2048))
    ref_a = _reference(xa, w1, b1, w2, b2)
    assert out_a.shape == (2, dim, 1, 1, 1), out_a.shape
    assert jnp.allclose(out_a.astype(jnp.float32), ref_a, atol=1e-5, rtol=1e-5), \
        float(jnp.max(jnp.abs(out_a.astype(jnp.float32) - ref_a)))

    # Config B: N == 1 spatial core-split path (odd step count exercises the
    # clamped/skipped trailing block), ragged tail, ts forced to 512.
    xb = jax.random.normal(kx2, (1, dim, 4, 8, 75), dtype=jnp.float32)  # S=2400
    out_b = jax.block_until_ready(
        chattn_block(xb, w1, b1, w2, b2, split_spatial=True, max_block_lanes=512))
    ref_b = _reference(xb, w1, b1, w2, b2)
    assert out_b.shape == (1, dim, 1, 1, 1), out_b.shape
    assert jnp.allclose(out_b.astype(jnp.float32), ref_b, atol=1e-5, rtol=1e-5), \
        float(jnp.max(jnp.abs(out_b.astype(jnp.float32) - ref_b)))

    print("KERNEL_OK")
</pallas_src>

<mosaic_0001>
module attributes {stable_mosaic.version = 11 : i64} {
  func.func @_chattn_fused_kernel(%arg0: i32, %arg1: i32, %arg2: memref<1x64x2048xf32, #tpu.memory_space<vmem>>, %arg3: memref<64x64xf32, #tpu.memory_space<vmem>>, %arg4: memref<1x64xf32, #tpu.memory_space<vmem>>, %arg5: memref<64x64xf32, #tpu.memory_space<vmem>>, %arg6: memref<1x64xf32, #tpu.memory_space<vmem>>, %arg7: memref<1x1x64xf32, #tpu.memory_space<vmem>>, %arg8: memref<1x64x1024xf32, #tpu.memory_space<vmem>>) attributes {dimension_semantics = [#tpu.dimension_semantics<parallel>, #tpu.dimension_semantics<arbitrary>], iteration_bounds = array<i64: 2, 2>, scalar_prefetch = 0 : i64, scratch_operands = 1 : i64, tpu.core_type = #tpu.core_type<tc>, window_params = [{transform_indices = @transform_0, window_bounds = array<i64: 1, 64, 2048>}, {pipeline_mode = #tpu.pipeline_mode<synchronous>, transform_indices = @transform_1, window_bounds = array<i64: 64, 64>}, {pipeline_mode = #tpu.pipeline_mode<synchronous>, transform_indices = @transform_2, window_bounds = array<i64: 1, 64>}, {pipeline_mode = #tpu.pipeline_mode<synchronous>, transform_indices = @transform_3, window_bounds = array<i64: 64, 64>}, {pipeline_mode = #tpu.pipeline_mode<synchronous>, transform_indices = @transform_4, window_bounds = array<i64: 1, 64>}, {transform_indices = @transform_5, window_bounds = array<i64: 1, 1, 64>}]} {
    %c0_i32 = arith.constant 0 : i32
    %0 = arith.cmpi eq, %arg1, %c0_i32 : i32
    %1 = arith.extui %0 : i1 to i32
    %c0_i32_0 = arith.constant 0 : i32
    %2 = arith.cmpi ne, %1, %c0_i32_0 : i32
    scf.if %2 {
      %cst = arith.constant 0.000000e+00 : f32
      %12 = vector.broadcast %cst : f32 to vector<1x64x1024xf32>
      %c0 = arith.constant 0 : index
      %c0_6 = arith.constant 0 : index
      %c0_7 = arith.constant 0 : index
      %13 = vector.load %arg8[%c0, %c0_6, %c0_7] : memref<1x64x1024xf32, #tpu.memory_space<vmem>>, vector<1x64x1024xf32>
      tpu.vector_store %arg8[%c0, %c0_6, %c0_7], %12 {strides = array<i32>} : memref<1x64x1024xf32, #tpu.memory_space<vmem>>, vector<1x64x1024xf32>,
    } else {
    }
    %c1_i32 = arith.constant 1 : i32
    %3 = arith.cmpi slt, %arg1, %c1_i32 : i32
    %4 = arith.extui %3 : i1 to i32
    %c0_i32_1 = arith.constant 0 : i32
    %5 = arith.cmpi ne, %4, %c0_i32_1 : i32
    scf.if %5 {
      %c0 = arith.constant 0 : index
      %c0_6 = arith.constant 0 : index
      %c0_7 = arith.constant 0 : index
      %12 = vector.load %arg8[%c0, %c0_6, %c0_7] : memref<1x64x1024xf32, #tpu.memory_space<vmem>>, vector<1x64x1024xf32>
      %c0_8 = arith.constant 0 : index
      %c0_9 = arith.constant 0 : index
      %c0_10 = arith.constant 0 : index
      %13 = vector.load %arg2[%c0_8, %c0_9, %c0_10] : memref<1x64x2048xf32, #tpu.memory_space<vmem>>, vector<1x64x1024xf32>
      %14 = arith.addf %12, %13 : vector<1x64x1024xf32>
      %c0_11 = arith.constant 0 : index
      %c0_12 = arith.constant 0 : index
      %c0_13 = arith.constant 0 : index
      %15 = vector.load %arg8[%c0_11, %c0_12, %c0_13] : memref<1x64x1024xf32, #tpu.memory_space<vmem>>, vector<1x64x1024xf32>
      tpu.vector_store %arg8[%c0_11, %c0_12, %c0_13], %14 {strides = array<i32>} : memref<1x64x1024xf32, #tpu.memory_space<vmem>>, vector<1x64x1024xf32>,
      %c0_14 = arith.constant 0 : index
      %c0_15 = arith.constant 0 : index
      %c0_16 = arith.constant 0 : index
      %16 = vector.load %arg8[%c0_14, %c0_15, %c0_16] : memref<1x64x1024xf32, #tpu.memory_space<vmem>>, vector<1x64x1024xf32>
      %c0_17 = arith.constant 0 : index
      %c0_18 = arith.constant 0 : index
      %c1024 = arith.constant 1024 : index
      %17 = vector.load %arg2[%c0_17, %c0_18, %c1024] : memref<1x64x2048xf32, #tpu.memory_space<vmem>>, vector<1x64x1024xf32>
      %18 = arith.addf %16, %17 : vector<1x64x1024xf32>
      %c0_19 = arith.constant 0 : index
      %c0_20 = arith.constant 0 : index
      %c0_21 = arith.constant 0 : index
      %19 = vector.load %arg8[%c0_19, %c0_20, %c0_21] : memref<1x64x1024xf32, #tpu.memory_space<vmem>>, vector<1x64x1024xf32>
      tpu.vector_store %arg8[%c0_19, %c0_20, %c0_21], %18 {strides = array<i32>} : memref<1x64x1024xf32, #tpu.memory_space<vmem>>, vector<1x64x1024xf32>,
    } else {
    }
    %c1_i32_2 = arith.constant 1 : i32
    %6 = arith.cmpi eq, %arg1, %c1_i32_2 : i32
    %7 = arith.extui %6 : i1 to i32
    %c0_i32_3 = arith.constant 0 : i32
    %8 = arith.cmpi ne, %7, %c0_i32_3 : i32
    scf.if %8 {
      %c0 = arith.constant 0 : index
      %c0_6 = arith.constant 0 : index
      %c0_7 = arith.constant 0 : index
      %12 = vector.load %arg8[%c0, %c0_6, %c0_7] : memref<1x64x1024xf32, #tpu.memory_space<vmem>>, vector<1x64x768xf32>
      %c0_8 = arith.constant 0 : index
      %c0_9 = arith.constant 0 : index
      %c0_10 = arith.constant 0 : index
      %13 = vector.load %arg2[%c0_8, %c0_9, %c0_10] : memref<1x64x2048xf32, #tpu.memory_space<vmem>>, vector<1x64x768xf32>
      %14 = arith.addf %12, %13 : vector<1x64x768xf32>
      %c0_11 = arith.constant 0 : index
      %c0_12 = arith.constant 0 : index
      %c0_13 = arith.constant 0 : index
      %15 = vector.load %arg8[%c0_11, %c0_12, %c0_13] : memref<1x64x1024xf32, #tpu.memory_space<vmem>>, vector<1x64x768xf32>
      tpu.vector_store %arg8[%c0_11, %c0_12, %c0_13], %14 {strides = array<i32>} : memref<1x64x1024xf32, #tpu.memory_space<vmem>>, vector<1x64x768xf32>,
      %c0_14 = arith.constant 0 : index
      %c0_15 = arith.constant 0 : index
      %c768 = arith.constant 768 : index
      %16 = vector.load %arg2[%c0_14, %c0_15, %c768] : memref<1x64x2048xf32, #tpu.memory_space<vmem>>, vector<1x64x128xf32>
      %17 = tpu.iota {dimensions = array<i32: 2>} : vector<1x64x128xi32>
      %c0_16 = arith.constant 0 : index
      %c0_17 = arith.constant 0 : index
      %c0_18 = arith.constant 0 : index
      %18 = vector.load %arg8[%c0_16, %c0_17, %c0_18] : memref<1x64x1024xf32, #tpu.memory_space<vmem>>, vector<1x64x128xf32>
      %c32_i32 = arith.constant 32 : i32
      %19 = vector.broadcast %c32_i32 : i32 to vector<1x64x128xi32>
      %20 = arith.cmpi slt, %17, %19 : vector<1x64x128xi32>
      %cst = arith.constant 0.000000e+00 : f32
      %21 = vector.broadcast %cst : f32 to vector<1x64x128xf32>
      %22 = arith.select %20, %16, %21 : vector<1x64x128xi1>, vector<1x64x128xf32>
      %23 = arith.addf %18, %22 : vector<1x64x128xf32>
      %c0_19 = arith.constant 0 : index
      %c0_20 = arith.constant 0 : index
      %c0_21 = arith.constant 0 : index
      %24 = vector.load %arg8[%c0_19, %c0_20, %c0_21] : memref<1x64x1024xf32, #tpu.memory_space<vmem>>, vector<1x64x128xf32>
      tpu.vector_store %arg8[%c0_19, %c0_20, %c0_21], %23 {strides = array<i32>} : memref<1x64x1024xf32, #tpu.memory_space<vmem>>, vector<1x64x128xf32>,
    } else {
    }
    %c1_i32_4 = arith.constant 1 : i32
    %9 = arith.cmpi eq, %arg1, %c1_i32_4 : i32
    %10 = arith.extui %9 : i1 to i32
    %c0_i32_5 = arith.constant 0 : i32
    %11 = arith.cmpi ne, %10, %c0_i32_5 : i32
    scf.if %11 {
      %c0 = arith.constant 0 : index
      %c0_6 = arith.constant 0 : index
      %c0_7 = arith.constant 0 : index
      %12 = vector.load %arg8[%c0, %c0_6, %c0_7] : memref<1x64x1024xf32, #tpu.memory_space<vmem>>, vector<1x64x1024xf32>
      %cst = arith.constant dense<0.000000e+00> : vector<1x64xf32>
      %13 = vector.multi_reduction <add>, %12, %cst [2] : vector<1x64x1024xf32> to vector<1x64xf32>
      %cst_8 = arith.constant 3.51123599E-4 : f32
      %14 = vector.broadcast %cst_8 : f32 to vector<1x64xf32>
      %15 = arith.mulf %13, %14 : vector<1x64xf32>
      %c0_9 = arith.constant 0 : index
      %c0_10 = arith.constant 0 : index
      %16 = vector.load %arg3[%c0_9, %c0_10] : memref<64x64xf32, #tpu.memory_space<vmem>>, vector<64x64xf32>
      %cst_11 = arith.constant dense<0.000000e+00> : vector<1x64xf32>
      %17 = tpu.matmul %15, %16, %cst_11 {dimension_numbers = #tpu.dot_dimension_numbers<[1], [0], [0], [1], [0, 0, 1, 1], [], []>} : vector<1x64xf32>, vector<64x64xf32>, vector<1x64xf32> -> vector<1x64xf32>
      %c0_12 = arith.constant 0 : index
      %c0_13 = arith.constant 0 : index
      %18 = vector.load %arg4[%c0_12, %c0_13] : memref<1x64xf32, #tpu.memory_space<vmem>>, vector<1x64xf32>
      %19 = arith.addf %17, %18 : vector<1x64xf32>
      %20 = arith.negf %19 : vector<1x64xf32>
      %21 = math.exp %20 : vector<1x64xf32>
      %cst_14 = arith.constant 1.000000e+00 : f32
      %22 = vector.broadcast %cst_14 : f32 to vector<1x64xf32>
      %23 = arith.addf %22, %21 : vector<1x64xf32>
      %24 = arith.divf %22, %23 : vector<1x64xf32>
      %25 = arith.mulf %19, %24 : vector<1x64xf32>
      %c0_15 = arith.constant 0 : index
      %c0_16 = arith.constant 0 : index
      %26 = vector.load %arg5[%c0_15, %c0_16] : memref<64x64xf32, #tpu.memory_space<vmem>>, vector<64x64xf32>
      %cst_17 = arith.constant dense<0.000000e+00> : vector<1x64xf32>
      %27 = tpu.matmul %25, %26, %cst_17 {dimension_numbers = #tpu.dot_dimension_numbers<[1], [0], [0], [1], [0, 0, 1, 1], [], []>} : vector<1x64xf32>, vector<64x64xf32>, vector<1x64xf32> -> vector<1x64xf32>
      %c0_18 = arith.constant 0 : index
      %c0_19 = arith.constant 0 : index
      %28 = vector.load %arg6[%c0_18, %c0_19] : memref<1x64xf32, #tpu.memory_space<vmem>>, vector<1x64xf32>
      %29 = arith.addf %27, %28 : vector<1x64xf32>
      %30 = arith.negf %29 : vector<1x64xf32>
      %31 = math.exp %30 : vector<1x64xf32>
      %cst_20 = arith.constant 1.000000e+00 : f32
      %32 = vector.broadcast %cst_20 : f32 to vector<1x64xf32>
      %33 = arith.addf %32, %31 : vector<1x64xf32>
      %34 = arith.divf %32, %33 : vector<1x64xf32>
      %35 = vector.shape_cast %34 : vector<1x64xf32> to vector<1x1x64xf32>
      %c0_21 = arith.constant 0 : index
      %c0_22 = arith.constant 0 : index
      %c0_23 = arith.constant 0 : index
      %36 = vector.load %arg7[%c0_21, %c0_22, %c0_23] : memref<1x1x64xf32, #tpu.memory_space<vmem>>, vector<1x1x64xf32>
      tpu.vector_store %arg7[%c0_21, %c0_22, %c0_23], %35 {strides = array<i32>} : memref<1x1x64xf32, #tpu.memory_space<vmem>>, vector<1x1x64xf32>,
    } else {
    }
    return
  }
  func.func @transform_0(%arg0: i32, %arg1: i32) -> (i32, i32, i32) {
    %c0_i32 = arith.constant 0 : i32
    %c0_i32_0 = arith.constant 0 : i32
    return %arg0, %c0_i32, %arg1 : i32, i32, i32
  }
  func.func @transform_1(%arg0: i32, %arg1: i32) -> (i32, i32) {
    %c0_i32 = arith.constant 0 : i32
    %c0_i32_0 = arith.constant 0 : i32
    %c0_i32_1 = arith.constant 0 : i32
    return %c0_i32, %c0_i32_0 : i32, i32
  }
  func.func @transform_2(%arg0: i32, %arg1: i32) -> (i32, i32) {
    %c0_i32 = arith.constant 0 : i32
    %c0_i32_0 = arith.constant 0 : i32
    %c0_i32_1 = arith.constant 0 : i32
    return %c0_i32, %c0_i32_0 : i32, i32
  }
  func.func @transform_3(%arg0: i32, %arg1: i32) -> (i32, i32) {
    %c0_i32 = arith.constant 0 : i32
    %c0_i32_0 = arith.constant 0 : i32
    %c0_i32_1 = arith.constant 0 : i32
    return %c0_i32, %c0_i32_0 : i32, i32
  }
  func.func @transform_4(%arg0: i32, %arg1: i32) -> (i32, i32) {
    %c0_i32 = arith.constant 0 : i32
    %c0_i32_0 = arith.constant 0 : i32
    %c0_i32_1 = arith.constant 0 : i32
    return %c0_i32, %c0_i32_0 : i32, i32
  }
  func.func @transform_5(%arg0: i32, %arg1: i32) -> (i32, i32, i32) {
    %c0_i32 = arith.constant 0 : i32
    %c0_i32_0 = arith.constant 0 : i32
    %c0_i32_1 = arith.constant 0 : i32
    return %arg0, %c0_i32, %c0_i32_0 : i32, i32, i32
  }
}

</mosaic_0001>

<bundles_post_ra>
// kernel: tpu_custom_call.1
= control target key start
LH: loop header
LB: loop body
LE: loop exit
PB: predicated region body
PF: predicated region fallthrough
CT: control target
= control target key end

     0   :  { %s3024_s0 = inlined_call_operand.hbm [shape: f32[2,64,2848], index: 0, kind: input, shape index: {}]   ;;  %s3025_s1 = inlined_call_operand.hbm [shape: f32[64,64], index: 1, kind: input, shape index: {}]   ;;  %s3026_s2 = inlined_call_operand.hbm [shape: f32[1,64], index: 2, kind: input, shape index: {}]   ;;  %s3027_s3 = inlined_call_operand.hbm [shape: f32[64,64], index: 3, kind: input, shape index: {}]   ;;  %s3028_s4 = inlined_call_operand.hbm [shape: f32[1,64], index: 4, kind: input, shape index: {}]   ;;  %s3029_s5 = inlined_call_operand.hbm [shape: f32[2,1,64], index: 5, kind: output, shape index: {}]  }
   0x1   :  { %3039 = sst [smem:[#allocation35_spill]] %s3025_s1 }
   0x2   :  { %3040 = sst [smem:[#allocation36_spill]] %s3026_s2 }
   0x3   :  { %3041 = sst [smem:[#allocation37_spill]] %s3027_s3 }
   0x4   :  { %3042 = sst [smem:[#allocation38_spill]] %s3028_s4 }
   0x5   :  { %10 = vsyncpa [#allocation4], 0 }
   0x6   :  { %12 = vsyncpa [#allocation4 + $0x1], 0 }
   0x7   :  { %13 = vsyncpa [#allocation7], 0 }
   0x8   :  { %14 = vsyncpa [#allocation10], 0 }
   0x9   :  { %15 = vsyncpa [#allocation5], 0 }
   0xa   :  { %17 = vsyncpa [#allocation5 + $0x1], 0  ;;  %s2208_s18 = smov 0   ;;  %s2210_s19 = smov 0  }
   0xb   :  { %s2212_s20 = smov 0   ;;  %s2214_s21 = smov 0  }
   0xc   :  { %s2216_s22 = smov 0   ;;  %s2218_s23 = smov 0  }
   0xd   :  { %s2220_s24 = smov 0   ;;  %s2222_s25 = smov 0  }
   0xe   :  { %s2224_s26 = smov 0   ;;  %s2226_s27 = smov 0  }
   0xf   :  { %s2228_s28 = smov 0  }
  0x10 LB: > { %3043 = sst [smem:[#allocation17_spill]] %s2131_s20  ;;  %s1662_s29 = sadd.s32 4294967295, %s2163_s28   ;;  %s2163_s28 = sphi %s2228_s28, %s23_s28   ;;  %s2159_s27 = sphi %s2226_s27, %s3101_s27   ;;  %s2155_s26 = sphi %s2224_s26, %s3100_s26   ;;  %s2151_s25 = sphi %s2222_s25, %s3099_s25   ;;  %s2147_s24 = sphi %s2220_s24, %s3091_s24   ;;  %s2143_s23 = sphi %s2218_s23, %s3098_s23   ;;  %s2139_s22 = sphi %s2216_s22, %s3097_s22   ;;  %s2135_s21 = sphi %s2214_s21, %s3096_s21   ;;  %s2131_s20 = sphi %s2212_s20, %s3089_s20   ;;  %s2127_s19 = sphi %s2210_s19, %s3095_s19   ;;  %s2123_s18 = sphi %s2208_s18, %s3094_s18  }
  0x11   : > { %3044 = sst [smem:[#allocation18_spill]] %s2155_s26  ;;  %s1663_s30 = sadd.s32 4294967294, %s2163_s28  }
  0x12   : > { %s32_s6 = sadd.s32 1, %s2155_s26  ;;  %s35_s7 = sadd.s32 1, %s2159_s27 }
  0x13   : > { %p33_p0 = scmp.ge.s32.totalorder %s32_s6, 2  ;;  %s44_s8 = sadd.s32 1, %s2143_s23 }
  0x14   : > { %p51_p1 = scmp.ne.s32.totalorder %s2143_s23, %s2139_s22  ;;  %p52_p2 = scmp.eq.s32.totalorder %s2163_s28, 0 }
  0x15   : > { %s3103_s6 = smov (%p33_p0, %s32_s6), 0  ;;  %s3105_s7 = smov (!%p33_p0, %s35_s7), %s2159_s27 }
  0x16   : > { %3045 = sst [smem:[#allocation19_spill]] %s3103_s6  ;;  %s40_s9 = ssub.s32 %s2155_s26, %s3103_s6 }
  0x17   : > { %p2274_p3 = por %p52_p2, %p51_p1  ;;  %p37_p4 = scmp.ge.s32.totalorder %s3105_s7, 2 }
  0x18   : > { %p57_p5 = scmp.ne.s32.totalorder %s2139_s22, %s2135_s21  ;;  %p2279_p6 = scmp.eq.s32.totalorder %s1662_s29, 0 }
  0x19   : > { %s154_s12 = sadd.s32 1, %s2131_s20  ;;  %s3107_s7 = smov (%p37_p4, %s3105_s7), 0 }
  0x1a   : > { %s3047_s11 = scalar_select %p2279_p6, 1, 0 }
  0x1b   : > { %3048 = sst [smem:[#allocation20_spill]] %s3107_s7  ;;  %p2288_p7 = por %p2279_p6, %p57_p5 }
  0x1c   : > { %p164_p8 = scmp.ne.s32.totalorder %s2131_s20, %s2127_s19  ;;  %s39_s14 = ssub.s32 %s2159_s27, %s3107_s7 }
  0x1d   : > { %s3049_s13 = scalar_select %p2288_p7, 1, 0 }
  0x1e   : > { %p165_p9 = scmp.eq.s32.totalorder %s1662_s29, 3  ;;  %s41_s15 = sor.u32 %s40_s9, %s39_s14 }
  0x1f   : > { %p152_p10 = scmp.eq.s32.totalorder %s39_s14, 0  ;;  %p42_p11 = scmp.eq.s32.totalorder %s41_s15, 0 }
  0x20   : > { %p2296_p12 = por %p165_p9, %p164_p8  ;;  %p170_p13 = scmp.ne.s32.totalorder %s2127_s19, %s2123_s18 }
  0x21   : > { %s2301_s17 = scalar_select %p152_p10, %s2131_s20, %s154_s12  }
  0x22   : > { %s3050_s16 = scalar_select %p2296_p12, 1, 0 }
  0x23   : > { %3051 = sst [smem:[#allocation21_spill]] %s2301_s17  ;;  %p171_p0 = scmp.eq.s32.totalorder %s1663_s30, 3 }
  0x24   : > { %s2304_s21 = scalar_select %p42_p11, %s2143_s23, %s44_s8  }
  0x25   : > { %p1664_p1 = scmp.ge.s32.totalorder %s2163_s28, 1  ;;  %p178_p2 = scmp.lt.s32.totalorder %s2163_s28, 5 }
  0x26   : > { %3052 = sst [smem:[#allocation22_spill]] %s2304_s21  ;;  %p2310_p4 = por %p171_p0, %p170_p13 }
  0x27   : > { %p2314_p5 = pnand %p1664_p1, %p178_p2  ;;  %s2165_s9 = smov [#allocation6]  }
  0x28   : > { %s3053_s6 = scalar_select %p2310_p4, 1, 0 }
  0x29   : > { %s190_s14 = sshll.u32 %s2165_s9, 4  ;;  %p1772_p8 = pneg %p2314_p5  ;;  %s191_s14 = int_to_ptr.vmem [resolvable:$true] %s190_s14 }
  0x2a   : > { %3054 = sst [smem:[#allocation23_spill]] %s3053_s6  ;;  %s2166_s30 = smov [#allocation9]  }
  0x2b   : > { %p2322_p9 = pnand %p1772_p8, %p2279_p6  ;;  %s214_s12 = sshll.u32 %s2166_s30, 4  ;;  %s215_s12 = int_to_ptr.vmem [resolvable:$true] %s214_s12 }
  0x2c   : > { %s2167_s15 = smov [#allocation8]   ;;  %s1916_s21 = scalar_lea.vmem %s191_s14, 1024 }
  0x2d   : > { %s204_s7 = sshll.u32 %s2167_s15, 4  ;;  %p1907_p10 = pneg %p2322_p9  ;;  %s205_s7 = int_to_ptr.vmem [resolvable:$true] %s204_s7 }
  0x2e   : > { %p1917_p11 = scmp.ne.s32.totalorder %s191_s14, %s1916_s21  ;;  %p1924_p1 = scmp.lt.s32.totalorder %s191_s14, %s191_s14 }
  0x2f   : > { %p1925_p2 = scmp.lt.s32.totalorder %s1916_s21, %s1916_s21 }
  0x30   : > { %p1919_p13 = pnand %p1917_p11, %p1907_p10 }
  0x31   : > { %p1926_p8 = por %p1925_p2, %p1924_p1 }
  0x32   : > { %p1920_p0 = pneg %p1919_p13 }
  0x34   : > { %p1927_p4 = pnand %p1926_p8, %p1920_p0 }
  0x36   : > { %1930 = shalt.err (!%p1927_p4)
}
  0x37   : > { %s2168_s9 = smov 128   ;;  %s2169_s30 = smov 8  }
  0x38   : > { %s3057_s1 = sld [smem:[#allocation35_spill]]  ;;  %s1942_s20 = scalar_lea.vmem %s215_s12, 1024 }
  0x39   : > { %p1943_p12 = scmp.ne.s32.totalorder %s215_s12, %s1942_s20  ;;  %p1950_p6 = scmp.lt.s32.totalorder %s215_s12, %s215_s12 }
  0x3a   : > { %p1951_p7 = scmp.lt.s32.totalorder %s1942_s20, %s1942_s20 }
  0x3b   : > { %p1945_p11 = pnand %p1943_p12, %p1907_p10 }
  0x3c   : > { %p1952_p1 = por %p1951_p7, %p1950_p6 }
  0x3d   : > { %p1946_p13 = pneg %p1945_p11 }
  0x3e   : > { %1775 = dma.hbm_to_vmem [thread:$0]  (!%p2322_p9), %s3057_s1, 1024, %s191_s14, [#allocation7], %s2168_s9, %s2168_s9, %s2169_s30  }
  0x3f   : > { %p1953_p0 = pnand %p1952_p1, %p1946_p13 }
  0x41   : > { %1956 = shalt.err (!%p1953_p0)
}
  0x42   : > { %s3058_s3 = sld [smem:[#allocation37_spill]]  ;;  %s1968_s17 = scalar_lea.vmem %s205_s7, 16 }
  0x43   : > { %p1969_p4 = scmp.ne.s32.totalorder %s205_s7, %s1968_s17  ;;  %s1975_s14 = scalar_lea.vmem %s205_s7, 32 }
  0x44   : > { %p1976_p8 = scmp.lt.s32.totalorder %s205_s7, %s205_s7  ;;  %p1977_p11 = scmp.lt.s32.totalorder %s1975_s14, %s1968_s17 }
  0x45   : > { %p1971_p2 = pnand %p1969_p4, %p1907_p10 }
  0x46   : > { %p1978_p6 = por %p1977_p11, %p1976_p8 }
  0x47   : > { %p1972_p12 = pneg %p1971_p2 }
  0x48   : > { %1781 = dma.hbm_to_vmem [thread:$0]  (!%p2322_p9), %s3058_s3, 1024, %s215_s12, [#allocation10], %s2168_s9, %s2168_s9, %s2169_s30  }
  0x49   : > { %p1979_p7 = pnand %p1978_p6, %p1972_p12 }
  0x4b   : > { %1982 = shalt.err (!%p1979_p7)
}
  0x4c   : > { %s3059_s2 = sld [smem:[#allocation36_spill]]  ;;  %s2170_s6 = smov [#allocation11]  }
  0x4d   : > { %s228_s12 = sshll.u32 %s2170_s6, 4  ;;  %s229_s12 = int_to_ptr.vmem [resolvable:$true] %s228_s12 }
  0x4e   : > { %s1994_s9 = scalar_lea.vmem %s229_s12, 16  ;;  %s2001_s30 = scalar_lea.vmem %s229_s12, 32 }
  0x4f   : > { %p1995_p13 = scmp.ne.s32.totalorder %s229_s12, %s1994_s9  ;;  %p2002_p4 = scmp.lt.s32.totalorder %s229_s12, %s229_s12 }
  0x50   : > { %p2003_p2 = scmp.lt.s32.totalorder %s2001_s30, %s1994_s9 }
  0x51   : > { %p1997_p1 = pnand %p1995_p13, %p1907_p10 }
  0x52   : > { %1778 = dma.hbm_to_vmem [thread:$0]  (!%p2322_p9), %s3059_s2, 16, %s205_s7, [#allocation7]  }
  0x53   : > { %p1998_p0 = pneg %p1997_p1  ;;  %p2004_p12 = por %p2003_p2, %p2002_p4 }
  0x55   : > { %p2005_p8 = pnand %p2004_p12, %p1998_p0 }
  0x57   : > { %2008 = shalt.err (!%p2005_p8)
}
  0x58   : > { %s3060_s4 = sld [smem:[#allocation38_spill]]  ;;  %p1669_p11 = scmp.ge.s32.totalorder %s2163_s28, 4 }
  0x5a   : > { %235 = sbr.rel (%p1669_p11) target bundleno = 119 (0x77), region = 32 }
  0x5e   : > { %1784 = dma.hbm_to_vmem [thread:$0]  (!%p2322_p9), %s3060_s4, 16, %s229_s12, [#allocation10]  }
  0x5f   : > { %238 = sbr.rel (!%p2274_p3) target bundleno = 119 (0x77), region = 36  ;;  %s239_s7 = sand.u32 (%p2274_p3), 1, %s2143_s23  }
  0x60   : > { %s1671_s14 = sshll.u32 (%p2274_p3), %s2155_s26, 4  ;;  %s1670_s20 = sshll.u32 (%p2274_p3), %s239_s7, 10 }
  0x61   : > { %s245_s15 = ssub.s32 (%p2274_p3), 23, %s1671_s14  ;;  %s2371_s12 = scalar_lea.sflag (%p2274_p3), [#allocation4], %s239_s7 }
  0x62   : > { %p246_p10 = scmp.lt.s32.totalorder (%p2274_p3), %s245_s15, 16  ;;  %s243_s9 = scalar_lea.vmem (%p2274_p3), [#allocation3], %s1670_s20 }
  0x64   : > { %s3109_s15 = smov (!%p246_p10, %s245_s15), 16 }
  0x65   : > { %s2368_s8 = sshll.u32 %s3109_s15, 10 }
  0x66   : > { %s250_s6 = ssub.s32 16384, %s2368_s8 }
  0x67   : > { %251 = vsyncadd %s2371_s12, %s250_s6  ;;  %p1673_p3 = scmp.ne.s32.totalorder %s2368_s8, 0  ;;  %s1752_s10 = smul.u32 184, %s2159_s27 }
  0x68   : > { %s1675_s30 = sshll.u32 %s3109_s15, 3  ;;  %s259_s21 = sshll.u32 %s243_s9, 4  ;;  %s260_s21 = int_to_ptr.vmem [resolvable:$true] %s259_s21 }
  0x69   : > { %s254_s17 = sadd.s32 %s1752_s10, %s1671_s14  ;;  %s2021_s4 = scalar_lea.vmem %s260_s21, %s2368_s8 }
  0x6a   : > { %s1674_s1 = sshll.u32 %s254_s17, 7  ;;  %p2022_p9 = scmp.ne.s32.totalorder %s260_s21, %s2021_s4 }
  0x6b   : > { %s256_s7 = scalar_lea.hbm %s3024_s0, %s1674_s1  ;;  %s2171_s20 = smov [#allocation3]  }
  0x6c   : > { %p2023_p6 = pnand %p2022_p9, %p1673_p3  ;;  %s2025_s6 = sshll.u32 %s2171_s20, 4  ;;  %s2026_s6 = int_to_ptr.vmem [resolvable:$false] %s2025_s6 }
  0x6d   : > { %s2027_s26 = scalar_lea.vmem %s2026_s6, 32768  ;;  %p2028_p13 = scmp.lt.s32.totalorder %s260_s21, %s2026_s6 }
  0x6e   : > { %p2024_p7 = pneg %p2023_p6  ;;  %p2029_p1 = scmp.lt.s32.totalorder %s2027_s26, %s2021_s4 }
  0x70   : > { %p2030_p0 = por %p2029_p1, %p2028_p13 }
  0x72   : > { %p2031_p4 = pnand %p2030_p0, %p2024_p7 }
  0x74   : > { %2034 = shalt.err (!%p2031_p4)
}
  0x75   : > { %s2172_s14 = smov 2944   ;;  %s2173_s2 = smov 2048  }
  0x76   : > { %265 = dma.hbm_to_vmem [thread:$0]  (%p1673_p3), %s256_s7, %s2368_s8, %s260_s21, %s2371_s12, %s2172_s14, %s2173_s2, %s1675_s30  }
  0x77 PF: > { %271 = sbr.rel (%p2314_p5) target bundleno = 946 (0x3b2), region = 40  ;;  %s273_s1 = sand.u32 (!%p2314_p5), 1, %s2139_s22  }
  0x78   : > { %s1679_s3 = sshll.u32 (!%p2314_p5), %s273_s1, 10  ;;  %s274_s4 = scalar_lea.sflag (!%p2314_p5), [#allocation4], %s273_s1 }
  0x79   : > { %s2390_s26 = scalar_lea.vmem (!%p2314_p5), [#allocation3], %s1679_s3  ;;  %p3061_p2 = scmp.ne.s32.totalorder (!%p2314_p5), %s3049_s13, 0 }
  0x7c   : > { %2106 = dma.done.wait (%p3061_p2), %s274_s4, 16384  }
  0x7d   : > { %2108 = vsyncadd (%p3061_p2), %s274_s4, 4294950912  ;;  %p3062_p12 = scmp.ne.s32.totalorder %s3047_s11, 0 }
  0x7f   : > { %2110 = dma.done.wait (%p3062_p12), [#allocation7], 1040  }
  0x80   : > { %2112 = vsyncadd (%p3062_p12), [#allocation7], 4294966256 }
  0x81   : > { %2114 = dma.done.wait (%p3062_p12), [#allocation10], 1040  }
  0x82   : > { %2116 = vsyncadd (%p3062_p12), [#allocation10], 4294966256  ;;  %s317_s29 = sand.u32 1, %s2127_s19   ;;  %p1684_p5 = scmp.ne.s32.totalorder %s2147_s24, 0 }
  0x83   : > { %s2407_s15 = scalar_lea.vmem [#allocation12], %s317_s29 }
  0x84   : > { %327 = sbr.rel (%p1684_p5) target bundleno = 170 (0xaa), region = 64 }
  0x89   : > { %v2174_v0 = vmov 0.0  }
  0x8a   : > { %328 = vst [vmem:[#allocation2 + $0xb0] sm:$0xff] %v2174_v0  ;;  %329 = vst [vmem:[#allocation2 + $0x1b0] sm:$0xff] %v2174_v0 }
  0x8b   : > { %330 = vst [vmem:[#allocation2 + $0xd8] sm:$0xff] %v2174_v0  ;;  %331 = vst [vmem:[#allocation2 + $0x18] sm:$0xff] %v2174_v0 }
  0x8c   : > { %332 = vst [vmem:[#allocation2 + $0x50] sm:$0xff] %v2174_v0  ;;  %333 = vst [vmem:[#allocation2 + $0x168] sm:$0xff] %v2174_v0 }
  0x8d   : > { %334 = vst [vmem:[#allocation2 + $0x130] sm:$0xff] %v2174_v0  ;;  %335 = vst [vmem:[#allocation2 + $0x48] sm:$0xff] %v2174_v0 }
  0x8e   : > { %336 = vst [vmem:[#allocation2 + $0x180] sm:$0xff] %v2174_v0  ;;  %337 = vst [vmem:[#allocation2 + $0x110] sm:$0xff] %v2174_v0 }
  0x8f   : > { %338 = vst [vmem:[#allocation2 + $0x118] sm:$0xff] %v2174_v0  ;;  %339 = vst [vmem:[#allocation2 + $0x98] sm:$0xff] %v2174_v0 }
  0x90   : > { %340 = vst [vmem:[#allocation2 + $0x120] sm:$0xff] %v2174_v0  ;;  %341 = vst [vmem:[#allocation2 + $0x150] sm:$0xff] %v2174_v0 }
  0x91   : > { %342 = vst [vmem:[#allocation2 + $0x108] sm:$0xff] %v2174_v0  ;;  %343 = vst [vmem:[#allocation2 + $0x60] sm:$0xff] %v2174_v0 }
  0x92   : > { %344 = vst [vmem:[#allocation2 + $0xe0] sm:$0xff] %v2174_v0  ;;  %345 = vst [vmem:[#allocation2 + $0x188] sm:$0xff] %v2174_v0 }
  0x93   : > { %346 = vst [vmem:[#allocation2 + $0x138] sm:$0xff] %v2174_v0  ;;  %347 = vst [vmem:[#allocation2 + $0x140] sm:$0xff] %v2174_v0 }
  0x94   : > { %348 = vst [vmem:[#allocation2 + $0x80] sm:$0xff] %v2174_v0  ;;  %349 = vst [vmem:[#allocation2 + $0x1a8] sm:$0xff] %v2174_v0 }
  0x95   : > { %350 = vst [vmem:[#allocation2 + $0x1b8] sm:$0xff] %v2174_v0  ;;  %351 = vst [vmem:[#allocation2 + $0x28] sm:$0xff] %v2174_v0 }
  0x96   : > { %352 = vst [vmem:[#allocation2 + $0x1e8] sm:$0xff] %v2174_v0  ;;  %353 = vst [vmem:[#allocation2 + $0xf8] sm:$0xff] %v2174_v0 }
  0x97   : > { %354 = vst [vmem:[#allocation2 + $0x160] sm:$0xff] %v2174_v0  ;;  %355 = vst [vmem:[#allocation2 + $0x30] sm:$0xff] %v2174_v0 }
  0x98   : > { %356 = vst [vmem:[#allocation2 + $0x1e0] sm:$0xff] %v2174_v0  ;;  %357 = vst [vmem:[#allocation2] sm:$0xff] %v2174_v0 }
  0x99   : > { %358 = vst [vmem:[#allocation2 + $0xf0] sm:$0xff] %v2174_v0  ;;  %359 = vst [vmem:[#allocation2 + $0x8] sm:$0xff] %v2174_v0 }
  0x9a   : > { %360 = vst [vmem:[#allocation2 + $0x148] sm:$0xff] %v2174_v0  ;;  %361 = vst [vmem:[#allocation2 + $0x1d0] sm:$0xff] %v2174_v0 }
  0x9b   : > { %362 = vst [vmem:[#allocation2 + $0x100] sm:$0xff] %v2174_v0  ;;  %363 = vst [vmem:[#allocation2 + $0xc8] sm:$0xff] %v2174_v0 }
  0x9c   : > { %364 = vst [vmem:[#allocation2 + $0x40] sm:$0xff] %v2174_v0  ;;  %365 = vst [vmem:[#allocation2 + $0x1f8] sm:$0xff] %v2174_v0 }
  0x9d   : > { %366 = vst [vmem:[#allocation2 + $0x20] sm:$0xff] %v2174_v0  ;;  %367 = vst [vmem:[#allocation2 + $0x128] sm:$0xff] %v2174_v0 }
  0x9e   : > { %368 = vst [vmem:[#allocation2 + $0x1a0] sm:$0xff] %v2174_v0  ;;  %369 = vst [vmem:[#allocation2 + $0x1f0] sm:$0xff] %v2174_v0 }
  0x9f   : > { %370 = vst [vmem:[#allocation2 + $0xe8] sm:$0xff] %v2174_v0  ;;  %371 = vst [vmem:[#allocation2 + $0x78] sm:$0xff] %v2174_v0 }
  0xa0   : > { %372 = vst [vmem:[#allocation2 + $0x70] sm:$0xff] %v2174_v0  ;;  %373 = vst [vmem:[#allocation2 + $0x90] sm:$0xff] %v2174_v0 }
  0xa1   : > { %374 = vst [vmem:[#allocation2 + $0x1d8] sm:$0xff] %v2174_v0  ;;  %375 = vst [vmem:[#allocation2 + $0xd0] sm:$0xff] %v2174_v0 }
  0xa2   : > { %376 = vst [vmem:[#allocation2 + $0xb8] sm:$0xff] %v2174_v0  ;;  %377 = vst [vmem:[#allocation2 + $0x88] sm:$0xff] %v2174_v0 }
  0xa3   : > { %378 = vst [vmem:[#allocation2 + $0xa8] sm:$0xff] %v2174_v0  ;;  %379 = vst [vmem:[#allocation2 + $0x1c8] sm:$0xff] %v2174_v0 }
  0xa4   : > { %380 = vst [vmem:[#allocation2 + $0x170] sm:$0xff] %v2174_v0  ;;  %381 = vst [vmem:[#allocation2 + $0x178] sm:$0xff] %v2174_v0 }
  0xa5   : > { %382 = vst [vmem:[#allocation2 + $0x68] sm:$0xff] %v2174_v0  ;;  %383 = vst [vmem:[#allocation2 + $0x190] sm:$0xff] %v2174_v0 }
  0xa6   : > { %384 = vst [vmem:[#allocation2 + $0x198] sm:$0xff] %v2174_v0  ;;  %385 = vst [vmem:[#allocation2 + $0x38] sm:$0xff] %v2174_v0 }
  0xa7   : > { %386 = vst [vmem:[#allocation2 + $0xc0] sm:$0xff] %v2174_v0  ;;  %387 = vst [vmem:[#allocation2 + $0x1c0] sm:$0xff] %v2174_v0 }
  0xa8   : > { %388 = vst [vmem:[#allocation2 + $0x158] sm:$0xff] %v2174_v0  ;;  %389 = vst [vmem:[#allocation2 + $0x10] sm:$0xff] %v2174_v0 }
  0xa9   : > { %390 = vst [vmem:[#allocation2 + $0x58] sm:$0xff] %v2174_v0  ;;  %391 = vst [vmem:[#allocation2 + $0xa0] sm:$0xff] %v2174_v0 }
  0xaa PF: > { %p1685_p8 = scmp.ge.s32.totalorder %s2147_s24, 1 }
  0xac   : > { %395 = sbr.rel (%p1685_p8) target bundleno = 255 (0xff), region = 68 }
  0xb1   : > { %v396_v1 = vld [vmem:[#allocation2 + $0xb0] sm:$0xff]  ;;  %v460_v2 = vld [vmem:[%s2390_s26] sm:$0xff]  ;;  %v461_v4 = vld [vmem:[%s2390_s26 + $0x8] sm:$0xff] }
  0xb2   : > { %v397_v3 = vld [vmem:[#allocation2 + $0x1b0] sm:$0xff]  ;;  %v398_v5 = vld [vmem:[#allocation2 + $0xd8] sm:$0xff]  ;;  %v464_v10 = vld [vmem:[%s2390_s26 + $0x20] sm:$0xff]  ;;  %v2495_v41 = vadd.f32 %v460_v2, %v396_v1 }
  0xb3   : > { %v462_v6 = vld [vmem:[%s2390_s26 + $0x10] sm:$0xff]  ;;  %v399_v7 = vld [vmem:[#allocation2 + $0x18] sm:$0xff]  ;;  %v401_v11 = vld [vmem:[#allocation2 + $0x168] sm:$0xff]  ;;  %v2497_v42 = vadd.f32 %v461_v4, %v397_v3 }
  0xb4   : > { %v463_v8 = vld [vmem:[%s2390_s26 + $0x18] sm:$0xff]  ;;  %v400_v9 = vld [vmem:[#allocation2 + $0x50] sm:$0xff]  ;;  %v465_v12 = vld [vmem:[%s2390_s26 + $0x28] sm:$0xff]  ;;  %v2499_v43 = vadd.f32 %v462_v6, %v398_v5 }
  0xb5   : > { %v402_v13 = vld [vmem:[#allocation2 + $0x130] sm:$0xff]  ;;  %v403_v15 = vld [vmem:[#allocation2 + $0x48] sm:$0xff]  ;;  %v467_v16 = vld [vmem:[%s2390_s26 + $0x38] sm:$0xff]  ;;  %v2501_v44 = vadd.f32 %v463_v8, %v399_v7  ;;  %v2507_v53 = vadd.f32 %v464_v10, %v400_v9  ;;  %v2509_v54 = vadd.f32 %v465_v12, %v401_v11 }
  0xb6   : > { %v466_v14 = vld [vmem:[%s2390_s26 + $0x30] sm:$0xff]  ;;  %v404_v17 = vld [vmem:[#allocation2 + $0x180] sm:$0xff]  ;;  %v469_v20 = vld [vmem:[%s2390_s26 + $0x88] sm:$0xff]  ;;  %v2513_v56 = vadd.f32 %v467_v16, %v403_v15 }
  0xb7   : > { %v468_v18 = vld [vmem:[%s2390_s26 + $0x80] sm:$0xff]  ;;  %v405_v19 = vld [vmem:[#allocation2 + $0x110] sm:$0xff]  ;;  %v406_v21 = vld [vmem:[#allocation2 + $0x118] sm:$0xff]  ;;  %v2511_v55 = vadd.f32 %v466_v14, %v402_v13 }
  0xb8   : > { %v470_v22 = vld [vmem:[%s2390_s26 + $0x90] sm:$0xff]  ;;  %v407_v23 = vld [vmem:[#allocation2 + $0x98] sm:$0xff]  ;;  %v408_v25 = vld [vmem:[#allocation2 + $0x120] sm:$0xff]  ;;  %v2519_v1 = vadd.f32 %v468_v18, %v404_v17  ;;  %v2521_v2 = vadd.f32 %v469_v20, %v405_v19 }
  0xb9   : > { %v471_v24 = vld [vmem:[%s2390_s26 + $0x98] sm:$0xff]  ;;  %v472_v26 = vld [vmem:[%s2390_s26 + $0xa0] sm:$0xff]  ;;  %v409_v27 = vld [vmem:[#allocation2 + $0x150] sm:$0xff]  ;;  %v2523_v3 = vadd.f32 %v470_v22, %v406_v21 }
  0xba   : > { %v473_v28 = vld [vmem:[%s2390_s26 + $0xa8] sm:$0xff]  ;;  %v474_v30 = vld [vmem:[%s2390_s26 + $0xb0] sm:$0xff]  ;;  %v411_v31 = vld [vmem:[#allocation2 + $0x60] sm:$0xff]  ;;  %v2525_v4 = vadd.f32 %v471_v24, %v407_v23  ;;  %v2531_v13 = vadd.f32 %v472_v26, %v408_v25 }
  0xbb   : > { %v410_v29 = vld [vmem:[#allocation2 + $0x108] sm:$0xff]  ;;  %v475_v32 = vld [vmem:[%s2390_s26 + $0xb8] sm:$0xff]  ;;  %v412_v33 = vld [vmem:[#allocation2 + $0xe0] sm:$0xff]  ;;  %v2533_v14 = vadd.f32 %v473_v28, %v409_v27 }
  0xbc   : > { %v476_v34 = vld [vmem:[%s2390_s26 + $0x100] sm:$0xff]  ;;  %v413_v35 = vld [vmem:[#allocation2 + $0x188] sm:$0xff]  ;;  %v414_v37 = vld [vmem:[#allocation2 + $0x138] sm:$0xff]  ;;  %3063 = vst [vmem:[#allocation24_spill] sm:$0xff] %v2525_v4  ;;  %v2535_v15 = vadd.f32 %v474_v30, %v410_v29  ;;  %v2537_v16 = vadd.f32 %v475_v32, %v411_v31 }
  0xbd   : > { %v477_v36 = vld [vmem:[%s2390_s26 + $0x108] sm:$0xff]  ;;  %v478_v38 = vld [vmem:[%s2390_s26 + $0x110] sm:$0xff]  ;;  %v415_v39 = vld [vmem:[#allocation2 + $0x140] sm:$0xff]  ;;  %3064 = vst [vmem:[#allocation25_spill] sm:$0xff] %v2531_v13  ;;  %v2543_v25 = vadd.f32 %v476_v34, %v412_v33 }
  0xbe   : > { %v479_v40 = vld [vmem:[%s2390_s26 + $0x118] sm:$0xff]  ;;  %v416_v45 = vld [vmem:[#allocation2 + $0x80] sm:$0xff]  ;;  %v417_v47 = vld [vmem:[#allocation2 + $0x1a8] sm:$0xff]  ;;  %3065 = vst [vmem:[#allocation26_spill] sm:$0xff] %v2533_v14  ;;  %v2545_v26 = vadd.f32 %v477_v36, %v413_v35  ;;  %v2547_v27 = vadd.f32 %v478_v38, %v414_v37 }
  0xbf   : > { %v480_v46 = vld [vmem:[%s2390_s26 + $0x120] sm:$0xff]  ;;  %v481_v48 = vld [vmem:[%s2390_s26 + $0x128] sm:$0xff]  ;;  %v418_v49 = vld [vmem:[#allocation2 + $0x1b8] sm:$0xff]  ;;  %3066 = vst [vmem:[#allocation27_spill] sm:$0xff] %v2535_v15  ;;  %v2549_v28 = vadd.f32 %v479_v40, %v415_v39 }
  0xc0   : > { %v482_v50 = vld [vmem:[%s2390_s26 + $0x130] sm:$0xff]  ;;  %v419_v51 = vld [vmem:[#allocation2 + $0x28] sm:$0xff]  ;;  %v483_v52 = vld [vmem:[%s2390_s26 + $0x138] sm:$0xff]  ;;  %3067 = vst [vmem:[#allocation28_spill] sm:$0xff] %v2537_v16  ;;  %v2555_v33 = vadd.f32 %v480_v46, %v416_v45  ;;  %v2557_v34 = vadd.f32 %v481_v48, %v417_v47 }
  0xc1   : > { %v420_v57 = vld [vmem:[#allocation2 + $0x1e8] sm:$0xff]  ;;  %v484_v58 = vld [vmem:[%s2390_s26 + $0x180] sm:$0xff]  ;;  %v421_v59 = vld [vmem:[#allocation2 + $0xf8] sm:$0xff]  ;;  %3068 = vst [vmem:[#allocation29_spill] sm:$0xff] %v2543_v25  ;;  %v2559_v35 = vadd.f32 %v482_v50, %v418_v49  ;;  %v2561_v36 = vadd.f32 %v483_v52, %v419_v51 }
  0xc2   : > { %v485_v60 = vld [vmem:[%s2390_s26 + $0x188] sm:$0xff]  ;;  %v422_v61 = vld [vmem:[#allocation2 + $0x160] sm:$0xff]  ;;  %v486_v62 = vld [vmem:[%s2390_s26 + $0x190] sm:$0xff]  ;;  %3069 = vst [vmem:[#allocation30_spill] sm:$0xff] %v2545_v26  ;;  %v2567_v4 = vadd.f32 %v484_v58, %v420_v57 }
  0xc3   : > { %v423_v63 = vld [vmem:[#allocation2 + $0x30] sm:$0xff]  ;;  %v487_v0 = vld [vmem:[%s2390_s26 + $0x198] sm:$0xff]  ;;  %v424_v5 = vld [vmem:[#allocation2 + $0x1e0] sm:$0xff]  ;;  %3070 = vst [vmem:[#allocation31_spill] sm:$0xff] %v2547_v27  ;;  %v2569_v45 = vadd.f32 %v485_v60, %v421_v59  ;;  %v2571_v46 = vadd.f32 %v486_v62, %v422_v61 }
  0xc4   : > { %v488_v6 = vld [vmem:[%s2390_s26 + $0x1a0] sm:$0xff]  ;;  %v489_v8 = vld [vmem:[%s2390_s26 + $0x1a8] sm:$0xff]  ;;  %v426_v9 = vld [vmem:[#allocation2 + $0xf0] sm:$0xff]  ;;  %3071 = vst [vmem:[#allocation32_spill] sm:$0xff] %v2549_v28  ;;  %v2573_v47 = vadd.f32 %v487_v0, %v423_v63 }
  0xc5   : > { %v425_v7 = vld [vmem:[#allocation2] sm:$0xff]  ;;  %v490_v10 = vld [vmem:[%s2390_s26 + $0x1b0] sm:$0xff]  ;;  %v427_v11 = vld [vmem:[#allocation2 + $0x8] sm:$0xff]  ;;  %3072 = vst [vmem:[#allocation33_spill] sm:$0xff] %v2559_v35  ;;  %v2576_v51 = vadd.f32 %v488_v6, %v424_v5 }
  0xc6   : > { %v491_v12 = vld [vmem:[%s2390_s26 + $0x1b8] sm:$0xff]  ;;  %v428_v17 = vld [vmem:[#allocation2 + $0x148] sm:$0xff]  ;;  %v492_v18 = vld [vmem:[%s2390_s26 + $0x200] sm:$0xff]  ;;  %3073 = vst [vmem:[#allocation34_spill] sm:$0xff] %v2561_v36  ;;  %v2578_v52 = vadd.f32 %v489_v8, %v425_v7  ;;  %v2580_v36 = vadd.f32 %v490_v10, %v426_v9 }
  0xc7   : > { %v429_v19 = vld [vmem:[#allocation2 + $0x1d0] sm:$0xff]  ;;  %v493_v20 = vld [vmem:[%s2390_s26 + $0x208] sm:$0xff]  ;;  %v430_v21 = vld [vmem:[#allocation2 + $0x100] sm:$0xff]  ;;  %v2582_v35 = vadd.f32 %v491_v12, %v427_v11  ;;  %v2586_v60 = vadd.f32 %v492_v18, %v428_v17 }
  0xc8   : > { %v494_v22 = vld [vmem:[%s2390_s26 + $0x210] sm:$0xff]  ;;  %v431_v23 = vld [vmem:[#allocation2 + $0xc8] sm:$0xff]  ;;  %v495_v24 = vld [vmem:[%s2390_s26 + $0x218] sm:$0xff]  ;;  %v2588_v61 = vadd.f32 %v493_v20, %v429_v19 }
  0xc9   : > { %v432_v29 = vld [vmem:[#allocation2 + $0x40] sm:$0xff]  ;;  %v433_v31 = vld [vmem:[#allocation2 + $0x1f8] sm:$0xff]  ;;  %v497_v32 = vld [vmem:[%s2390_s26 + $0x228] sm:$0xff]  ;;  %v2590_v62 = vadd.f32 %v494_v22, %v430_v21  ;;  %v2592_v63 = vadd.f32 %v495_v24, %v431_v23 }
  0xca   : > { %v496_v30 = vld [vmem:[%s2390_s26 + $0x220] sm:$0xff]  ;;  %v498_v15 = vld [vmem:[%s2390_s26 + $0x230] sm:$0xff]  ;;  %v435_v14 = vld [vmem:[#allocation2 + $0x128] sm:$0xff]  ;;  %v2597_v8 = vadd.f32 %v497_v32, %v433_v31 }
  0xcb   : > { %v434_v16 = vld [vmem:[#allocation2 + $0x20] sm:$0xff]  ;;  %v499_v13 = vld [vmem:[%s2390_s26 + $0x238] sm:$0xff]  ;;  %v437_v39 = vld [vmem:[#allocation2 + $0x1f0] sm:$0xff]  ;;  %v2595_v7 = vadd.f32 %v496_v30, %v432_v29 }
  0xcc   : > { %v436_v37 = vld [vmem:[#allocation2 + $0x1a0] sm:$0xff]  ;;  %v501_v40 = vld [vmem:[%s2390_s26 + $0x288] sm:$0xff]  ;;  %v502_v27 = vld [vmem:[%s2390_s26 + $0x290] sm:$0xff]  ;;  %v2599_v9 = vadd.f32 %v498_v15, %v434_v16  ;;  %v2601_v10 = vadd.f32 %v499_v13, %v435_v14 }
  0xcd   : > { %v500_v38 = vld [vmem:[%s2390_s26 + $0x280] sm:$0xff]  ;;  %v438_v28 = vld [vmem:[#allocation2 + $0xe8] sm:$0xff]  ;;  %v439_v26 = vld [vmem:[#allocation2 + $0x78] sm:$0xff]  ;;  %v2607_v19 = vadd.f32 %v501_v40, %v437_v39 }
  0xce   : > { %v503_v25 = vld [vmem:[%s2390_s26 + $0x298] sm:$0xff]  ;;  %v440_v48 = vld [vmem:[#allocation2 + $0x70] sm:$0xff]  ;;  %v504_v49 = vld [vmem:[%s2390_s26 + $0x2a0] sm:$0xff]  ;;  %v2605_v18 = vadd.f32 %v500_v38, %v436_v37  ;;  %v2609_v20 = vadd.f32 %v502_v27, %v438_v28 }
  0xcf   : > { %v441_v50 = vld [vmem:[#allocation2 + $0x90] sm:$0xff]  ;;  %v505_v57 = vld [vmem:[%s2390_s26 + $0x2a8] sm:$0xff]  ;;  %v442_v58 = vld [vmem:[#allocation2 + $0x1d8] sm:$0xff]  ;;  %v2611_v21 = vadd.f32 %v503_v25, %v439_v26  ;;  %v2615_v13 = vadd.f32 %v504_v49, %v440_v48 }
  0xd0   : > { %v506_v59 = vld [vmem:[%s2390_s26 + $0x2b0] sm:$0xff]  ;;  %v507_v5 = vld [vmem:[%s2390_s26 + $0x2b8] sm:$0xff]  ;;  %v508_v11 = vld [vmem:[%s2390_s26 + $0x300] sm:$0xff]  ;;  %v2617_v14 = vadd.f32 %v505_v57, %v441_v50 }
  0xd1   : > { %v443_v0 = vld [vmem:[#allocation2 + $0xd0] sm:$0xff]  ;;  %v444_v6 = vld [vmem:[#allocation2 + $0xb8] sm:$0xff]  ;;  %v445_v12 = vld [vmem:[#allocation2 + $0x88] sm:$0xff]  ;;  %v2619_v23 = vadd.f32 %v506_v59, %v442_v58 }
  0xd2   : > { %v509_v17 = vld [vmem:[%s2390_s26 + $0x308] sm:$0xff]  ;;  %v510_v16 = vld [vmem:[%s2390_s26 + $0x310] sm:$0xff]  ;;  %v716_v22 = vld [vmem:[%s2390_s26 + $0x40] sm:$0xff]  ;;  %v2626_v30 = vadd.f32 %v507_v5, %v443_v0  ;;  %v2635_v49 = vadd.f32 %v508_v11, %v444_v6 }
  0xd3   : > { %v446_v15 = vld [vmem:[#allocation2 + $0xa8] sm:$0xff]  ;;  %v511_v29 = vld [vmem:[%s2390_s26 + $0x318] sm:$0xff]  ;;  %v780_v27 = vadd.f32 %v716_v22, %v2495_v41  ;;  %v718_v25 = vld [vmem:[%s2390_s26 + $0x50] sm:$0xff]  ;;  %v2644_v5 = vadd.f32 %v509_v17, %v445_v12 }
  0xd4   : > { %v447_v24 = vld [vmem:[#allocation2 + $0x1c8] sm:$0xff]  ;;  %v719_v26 = vld [vmem:[%s2390_s26 + $0x58] sm:$0xff]  ;;  %v448_v31 = vld [vmem:[#allocation2 + $0x170] sm:$0xff]  ;;  %v782_v38 = vadd.f32 %v718_v25, %v2499_v43  ;;  %v2653_v12 = vadd.f32 %v510_v16, %v446_v15 }
  0xd5   : > { %v717_v28 = vld [vmem:[%s2390_s26 + $0x48] sm:$0xff]  ;;  %v512_v32 = vld [vmem:[%s2390_s26 + $0x320] sm:$0xff]  ;;  %v783_v39 = vadd.f32 %v719_v26, %v2501_v44  ;;  %v722_v41 = vld [vmem:[%s2390_s26 + $0x70] sm:$0xff]  ;;  %844 = vst [vmem:[#allocation2 + $0xb0] sm:$0xff] %v780_v27  ;;  %v2662_v15 = vadd.f32 %v511_v29, %v447_v24 }
  0xd6   : > { %v781_v37 = vadd.f32 %v717_v28, %v2497_v42  ;;  %v720_v40 = vld [vmem:[%s2390_s26 + $0x60] sm:$0xff]  ;;  %v721_v48 = vld [vmem:[%s2390_s26 + $0x68] sm:$0xff]  ;;  %v449_v50 = vld [vmem:[#allocation2 + $0x178] sm:$0xff]  ;;  %v786_v42 = vadd.f32 %v722_v41, %v2511_v55  ;;  %846 = vst [vmem:[#allocation2 + $0xd8] sm:$0xff] %v782_v38  ;;  %v2671_v24 = vadd.f32 %v512_v32, %v448_v31 }
  0xd7   : > { %v513_v57 = vld [vmem:[%s2390_s26 + $0x328] sm:$0xff]  ;;  %v784_v58 = vadd.f32 %v720_v40, %v2507_v53  ;;  %v785_v59 = vadd.f32 %v721_v48, %v2509_v54  ;;  %v723_v43 = vld [vmem:[%s2390_s26 + $0x78] sm:$0xff]  ;;  %v724_v44 = vld [vmem:[%s2390_s26 + $0xc0] sm:$0xff]  ;;  %847 = vst [vmem:[#allocation2 + $0x18] sm:$0xff] %v783_v39 }
  0xd8   : > { %v725_v0 = vld [vmem:[%s2390_s26 + $0xc8] sm:$0xff]  ;;  %v514_v11 = vld [vmem:[%s2390_s26 + $0x330] sm:$0xff]  ;;  %845 = vst [vmem:[#allocation2 + $0x1b0] sm:$0xff] %v781_v37  ;;  %v787_v53 = vadd.f32 %v723_v43, %v2513_v56  ;;  %v788_v54 = vadd.f32 %v724_v44, %v2519_v1  ;;  %v727_v27 = vld [vmem:[%s2390_s26 + $0xd8] sm:$0xff]  ;;  %v2680_v31 = vadd.f32 %v513_v57, %v449_v50 }
  0xd9   : > { %v450_v6 = vld [vmem:[#allocation2 + $0x68] sm:$0xff]  ;;  %v789_v55 = vadd.f32 %v725_v0, %v2521_v2  ;;  %v726_v22 = vld [vmem:[%s2390_s26 + $0xd0] sm:$0xff]  ;;  %v728_v28 = vld [vmem:[%s2390_s26 + $0xe0] sm:$0xff]  ;;  %848 = vst [vmem:[#allocation2 + $0x50] sm:$0xff] %v784_v58 }
  0xda   : > { %v451_v17 = vld [vmem:[#allocation2 + $0x190] sm:$0xff]  ;;  %v515_v25 = vld [vmem:[%s2390_s26 + $0x338] sm:$0xff]  ;;  %849 = vst [vmem:[#allocation2 + $0x168] sm:$0xff] %v785_v59  ;;  %850 = vst [vmem:[#allocation2 + $0x130] sm:$0xff] %v786_v42  ;;  %v790_v56 = vadd.f32 %v726_v22, %v2523_v3  ;;  %v2689_v50 = vadd.f32 %v514_v11, %v450_v6 }
  0xdb   : > { %v3074_v26 = vld [vmem:[#allocation24_spill] sm:$0xff]  ;;  %v3075_v37 = vld [vmem:[#allocation25_spill] sm:$0xff]  ;;  %v731_v40 = vld [vmem:[%s2390_s26 + $0xf8] sm:$0xff]  ;;  %851 = vst [vmem:[#allocation2 + $0x48] sm:$0xff] %v787_v53  ;;  %v2698_v6 = vadd.f32 %v515_v25, %v451_v17 }
  0xdc   : > { %v791_v1 = vadd.f32 %v727_v27, %v3074_v26  ;;  %v792_v2 = vadd.f32 %v728_v28, %v3075_v37  ;;  %v729_v38 = vld [vmem:[%s2390_s26 + $0xe8] sm:$0xff]  ;;  %v730_v39 = vld [vmem:[%s2390_s26 + $0xf0] sm:$0xff]  ;;  %v452_v16 = vld [vmem:[#allocation2 + $0x198] sm:$0xff]  ;;  %852 = vst [vmem:[#allocation2 + $0x180] sm:$0xff] %v788_v54 }
  0xdd   : > { %v516_v48 = vld [vmem:[%s2390_s26 + $0x380] sm:$0xff]  ;;  %853 = vst [vmem:[#allocation2 + $0x110] sm:$0xff] %v789_v55  ;;  %v3076_v41 = vld [vmem:[#allocation26_spill] sm:$0xff]  ;;  %v733_v0 = vld [vmem:[%s2390_s26 + $0x148] sm:$0xff] }
  0xde   : > { %v793_v3 = vadd.f32 %v729_v38, %v3076_v41  ;;  %v3077_v58 = vld [vmem:[#allocation27_spill] sm:$0xff]  ;;  %v3078_v42 = vld [vmem:[#allocation28_spill] sm:$0xff]  ;;  %v734_v22 = vld [vmem:[%s2390_s26 + $0x150] sm:$0xff]  ;;  %854 = vst [vmem:[#allocation2 + $0x118] sm:$0xff] %v790_v56  ;;  %v2707_v17 = vadd.f32 %v516_v48, %v452_v16 }
  0xdf   : > { %v794_v59 = vadd.f32 %v730_v39, %v3077_v58  ;;  %v795_v43 = vadd.f32 %v731_v40, %v3078_v42  ;;  %v732_v44 = vld [vmem:[%s2390_s26 + $0x140] sm:$0xff]  ;;  %v453_v29 = vld [vmem:[#allocation2 + $0x38] sm:$0xff]  ;;  %v517_v27 = vld [vmem:[%s2390_s26 + $0x388] sm:$0xff]  ;;  %855 = vst [vmem:[#allocation2 + $0x98] sm:$0xff] %v791_v1 }
  0xe0   : > { %856 = vst [vmem:[#allocation2 + $0x120] sm:$0xff] %v792_v2  ;;  %v3079_v53 = vld [vmem:[#allocation29_spill] sm:$0xff]  ;;  %v3080_v55 = vld [vmem:[#allocation30_spill] sm:$0xff]  ;;  %v3081_v26 = vld [vmem:[#allocation31_spill] sm:$0xff]  ;;  %v2716_v16 = vadd.f32 %v517_v27, %v453_v29 }
  0xe1   : > { %v796_v54 = vadd.f32 %v732_v44, %v3079_v53  ;;  %v797_v28 = vadd.f32 %v733_v0, %v3080_v55  ;;  %v798_v37 = vadd.f32 %v734_v22, %v3081_v26  ;;  %v735_v38 = vld [vmem:[%s2390_s26 + $0x158] sm:$0xff]  ;;  %v736_v39 = vld [vmem:[%s2390_s26 + $0x160] sm:$0xff]  ;;  %v737_v40 = vld [vmem:[%s2390_s26 + $0x168] sm:$0xff]  ;;  %857 = vst [vmem:[#allocation2 + $0x150] sm:$0xff] %v793_v3 }
  0xe2   : > { %v454_v32 = vld [vmem:[#allocation2 + $0xc0] sm:$0xff]  ;;  %v518_v41 = vld [vmem:[%s2390_s26 + $0x390] sm:$0xff]  ;;  %858 = vst [vmem:[#allocation2 + $0x108] sm:$0xff] %v794_v59  ;;  %859 = vst [vmem:[#allocation2 + $0x60] sm:$0xff] %v795_v43  ;;  %v800_v2 = vadd.f32 %v736_v39, %v2555_v33  ;;  %v801_v58 = vadd.f32 %v737_v40, %v2557_v34 }
  0xe3   : > { %v3082_v56 = vld [vmem:[#allocation32_spill] sm:$0xff]  ;;  %v738_v42 = vld [vmem:[%s2390_s26 + $0x170] sm:$0xff]  ;;  %v739_v44 = vld [vmem:[%s2390_s26 + $0x178] sm:$0xff]  ;;  %860 = vst [vmem:[#allocation2 + $0xe0] sm:$0xff] %v796_v54 }
  0xe4   : > { %v799_v1 = vadd.f32 %v735_v38, %v3082_v56  ;;  %v740_v0 = vld [vmem:[%s2390_s26 + $0x1c0] sm:$0xff]  ;;  %v519_v22 = vld [vmem:[%s2390_s26 + $0x398] sm:$0xff]  ;;  %861 = vst [vmem:[#allocation2 + $0x188] sm:$0xff] %v797_v28  ;;  %862 = vst [vmem:[#allocation2 + $0x138] sm:$0xff] %v798_v37 }
  0xe5   : > { %v455_v57 = vld [vmem:[#allocation2 + $0x1c0] sm:$0xff]  ;;  %v3083_v3 = vld [vmem:[#allocation33_spill] sm:$0xff]  ;;  %v3084_v43 = vld [vmem:[#allocation34_spill] sm:$0xff]  ;;  %v804_v34 = vadd.f32 %v740_v0, %v2567_v4  ;;  %864 = vst [vmem:[#allocation2 + $0x80] sm:$0xff] %v800_v2 }
  0xe6   : > { %v802_v59 = vadd.f32 %v738_v42, %v3083_v3  ;;  %v803_v33 = vadd.f32 %v739_v44, %v3084_v43  ;;  %v741_v53 = vld [vmem:[%s2390_s26 + $0x1c8] sm:$0xff]  ;;  %v742_v55 = vld [vmem:[%s2390_s26 + $0x1d0] sm:$0xff]  ;;  %v743_v26 = vld [vmem:[%s2390_s26 + $0x1d8] sm:$0xff]  ;;  %863 = vst [vmem:[#allocation2 + $0x140] sm:$0xff] %v799_v1 }
  0xe7   : > { %v456_v11 = vld [vmem:[#allocation2 + $0x158] sm:$0xff]  ;;  %v520_v38 = vld [vmem:[%s2390_s26 + $0x3a0] sm:$0xff]  ;;  %865 = vst [vmem:[#allocation2 + $0x1a8] sm:$0xff] %v801_v58  ;;  %v805_v54 = vadd.f32 %v741_v53, %v2569_v45  ;;  %v806_v28 = vadd.f32 %v742_v55, %v2571_v46  ;;  %v807_v4 = vadd.f32 %v743_v26, %v2573_v47  ;;  %v745_v39 = vld [vmem:[%s2390_s26 + $0x1e8] sm:$0xff]  ;;  %v2734_v53 = vadd.f32 %v519_v22, %v455_v57 }
  0xe8   : > { %v744_v37 = vld [vmem:[%s2390_s26 + $0x1e0] sm:$0xff]  ;;  %v746_v40 = vld [vmem:[%s2390_s26 + $0x1f0] sm:$0xff]  ;;  %v521_v56 = vld [vmem:[%s2390_s26 + $0x3a8] sm:$0xff]  ;;  %866 = vst [vmem:[#allocation2 + $0x1b8] sm:$0xff] %v802_v59  ;;  %v809_v46 = vadd.f32 %v745_v39, %v2578_v52  ;;  %v2725_v59 = vadd.f32 %v518_v41, %v454_v32  ;;  %v2742_v26 = vadd.f32 %v520_v38, %v456_v11 }
  0xe9   : > { %v457_v25 = vld [vmem:[#allocation2 + $0x10] sm:$0xff]  ;;  %867 = vst [vmem:[#allocation2 + $0x28] sm:$0xff] %v803_v33  ;;  %868 = vst [vmem:[#allocation2 + $0x1e8] sm:$0xff] %v804_v34  ;;  %v808_v45 = vadd.f32 %v744_v37, %v2576_v51  ;;  %v810_v47 = vadd.f32 %v746_v40, %v2580_v36  ;;  %v747_v1 = vld [vmem:[%s2390_s26 + $0x1f8] sm:$0xff] }
  0xea   : > { %v748_v2 = vld [vmem:[%s2390_s26 + $0x240] sm:$0xff]  ;;  %v749_v58 = vld [vmem:[%s2390_s26 + $0x248] sm:$0xff]  ;;  %v458_v48 = vld [vmem:[#allocation2 + $0x58] sm:$0xff]  ;;  %869 = vst [vmem:[#allocation2 + $0xf8] sm:$0xff] %v805_v54  ;;  %v811_v51 = vadd.f32 %v747_v1, %v2582_v35 }
  0xeb   : > { %v522_v42 = vld [vmem:[%s2390_s26 + $0x3b0] sm:$0xff]  ;;  %870 = vst [vmem:[#allocation2 + $0x160] sm:$0xff] %v806_v28  ;;  %871 = vst [vmem:[#allocation2 + $0x30] sm:$0xff] %v807_v4  ;;  %v812_v52 = vadd.f32 %v748_v2, %v2586_v60  ;;  %v813_v36 = vadd.f32 %v749_v58, %v2588_v61  ;;  %v751_v0 = vld [vmem:[%s2390_s26 + $0x258] sm:$0xff]  ;;  %v585_v28 = vadd.f32 %v521_v56, %v457_v25 }
  0xec   : > { %v750_v44 = vld [vmem:[%s2390_s26 + $0x250] sm:$0xff]  ;;  %v752_v3 = vld [vmem:[%s2390_s26 + $0x260] sm:$0xff]  ;;  %v523_v27 = vld [vmem:[%s2390_s26 + $0x3b8] sm:$0xff]  ;;  %872 = vst [vmem:[#allocation2 + $0x1e0] sm:$0xff] %v808_v45  ;;  %v815_v60 = vadd.f32 %v751_v0, %v2592_v63 }
  0xed   : > { %v459_v29 = vld [vmem:[#allocation2 + $0xa0] sm:$0xff]  ;;  %873 = vst [vmem:[#allocation2] sm:$0xff] %v809_v46  ;;  %874 = vst [vmem:[#allocation2 + $0xf0] sm:$0xff] %v810_v47  ;;  %v814_v35 = vadd.f32 %v750_v44, %v2590_v62  ;;  %v816_v43 = vadd.f32 %v752_v3, %v2595_v7  ;;  %v753_v61 = vld [vmem:[%s2390_s26 + $0x268] sm:$0xff] }
  0xee   : > { %v754_v33 = vld [vmem:[%s2390_s26 + $0x270] sm:$0xff]  ;;  %v755_v34 = vld [vmem:[%s2390_s26 + $0x278] sm:$0xff]  ;;  %875 = vst [vmem:[#allocation2 + $0x8] sm:$0xff] %v811_v51  ;;  %876 = vst [vmem:[#allocation2 + $0x148] sm:$0xff] %v812_v52  ;;  %v817_v32 = vadd.f32 %v753_v61, %v2597_v8 }
  0xef   : > { %877 = vst [vmem:[#allocation2 + $0x1d0] sm:$0xff] %v813_v36  ;;  %v818_v41 = vadd.f32 %v754_v33, %v2599_v9  ;;  %v819_v62 = vadd.f32 %v755_v34, %v2601_v10  ;;  %v756_v63 = vld [vmem:[%s2390_s26 + $0x2c0] sm:$0xff]  ;;  %v757_v55 = vld [vmem:[%s2390_s26 + $0x2c8] sm:$0xff]  ;;  %v758_v7 = vld [vmem:[%s2390_s26 + $0x2d0] sm:$0xff] }
  0xf0   : > { %878 = vst [vmem:[#allocation2 + $0x100] sm:$0xff] %v814_v35  ;;  %879 = vst [vmem:[#allocation2 + $0xc8] sm:$0xff] %v815_v60  ;;  %v820_v57 = vadd.f32 %v756_v63, %v2605_v18  ;;  %v821_v22 = vadd.f32 %v757_v55, %v2607_v19  ;;  %v822_v8 = vadd.f32 %v758_v7, %v2609_v20  ;;  %v759_v9 = vld [vmem:[%s2390_s26 + $0x2d8] sm:$0xff]  ;;  %v760_v54 = vld [vmem:[%s2390_s26 + $0x2e0] sm:$0xff] }
  0xf1   : > { %880 = vst [vmem:[#allocation2 + $0x40] sm:$0xff] %v816_v43  ;;  %v761_v10 = vld [vmem:[%s2390_s26 + $0x2e8] sm:$0xff]  ;;  %881 = vst [vmem:[#allocation2 + $0x1f8] sm:$0xff] %v817_v32  ;;  %v823_v11 = vadd.f32 %v759_v9, %v2611_v21  ;;  %v824_v38 = vadd.f32 %v760_v54, %v2615_v13  ;;  %v762_v4 = vld [vmem:[%s2390_s26 + $0x2f0] sm:$0xff]  ;;  %v586_v20 = vadd.f32 %v522_v42, %v458_v48 }
  0xf2   : > { %882 = vst [vmem:[#allocation2 + $0x20] sm:$0xff] %v818_v41  ;;  %883 = vst [vmem:[#allocation2 + $0x128] sm:$0xff] %v819_v62  ;;  %v825_v18 = vadd.f32 %v761_v10, %v2617_v14  ;;  %v763_v19 = vld [vmem:[%s2390_s26 + $0x2f8] sm:$0xff]  ;;  %v764_v37 = vld [vmem:[%s2390_s26 + $0x340] sm:$0xff]  ;;  %v826_v39 = vadd.f32 %v762_v4, %v2619_v23  ;;  %v587_v14 = vadd.f32 %v523_v27, %v459_v29 }
  0xf3   : > { %884 = vst [vmem:[#allocation2 + $0x1a0] sm:$0xff] %v820_v57  ;;  %885 = vst [vmem:[#allocation2 + $0x1f0] sm:$0xff] %v821_v22  ;;  %v827_v40 = vadd.f32 %v763_v19, %v2626_v30  ;;  %v828_v21 = vadd.f32 %v764_v37, %v2635_v49  ;;  %v765_v25 = vld [vmem:[%s2390_s26 + $0x348] sm:$0xff]  ;;  %v766_v13 = vld [vmem:[%s2390_s26 + $0x350] sm:$0xff] }
  0xf4   : > { %886 = vst [vmem:[#allocation2 + $0xe8] sm:$0xff] %v822_v8  ;;  %v767_v56 = vld [vmem:[%s2390_s26 + $0x358] sm:$0xff]  ;;  %887 = vst [vmem:[#allocation2 + $0x78] sm:$0xff] %v823_v11  ;;  %v829_v45 = vadd.f32 %v765_v25, %v2644_v5  ;;  %v830_v46 = vadd.f32 %v766_v13, %v2653_v12  ;;  %v768_v47 = vld [vmem:[%s2390_s26 + $0x360] sm:$0xff] }
  0xf5   : > { %888 = vst [vmem:[#allocation2 + $0x70] sm:$0xff] %v824_v38  ;;  %889 = vst [vmem:[#allocation2 + $0x90] sm:$0xff] %v825_v18  ;;  %v831_v23 = vadd.f32 %v767_v56, %v2662_v15  ;;  %v769_v30 = vld [vmem:[%s2390_s26 + $0x368] sm:$0xff]  ;;  %v770_v1 = vld [vmem:[%s2390_s26 + $0x370] sm:$0xff]  ;;  %v832_v49 = vadd.f32 %v768_v47, %v2671_v24 }
  0xf6   : > { %890 = vst [vmem:[#allocation2 + $0x1d8] sm:$0xff] %v826_v39  ;;  %891 = vst [vmem:[#allocation2 + $0xd0] sm:$0xff] %v827_v40  ;;  %v833_v2 = vadd.f32 %v769_v30, %v2680_v31  ;;  %v834_v58 = vadd.f32 %v770_v1, %v2689_v50  ;;  %v771_v5 = vld [vmem:[%s2390_s26 + $0x378] sm:$0xff]  ;;  %v772_v48 = vld [vmem:[%s2390_s26 + $0x3c0] sm:$0xff] }
  0xf7   : > { %892 = vst [vmem:[#allocation2 + $0xb8] sm:$0xff] %v828_v21  ;;  %v773_v12 = vld [vmem:[%s2390_s26 + $0x3c8] sm:$0xff]  ;;  %893 = vst [vmem:[#allocation2 + $0x88] sm:$0xff] %v829_v45  ;;  %v835_v15 = vadd.f32 %v771_v5, %v2698_v6  ;;  %v836_v42 = vadd.f32 %v772_v48, %v2707_v17  ;;  %v774_v24 = vld [vmem:[%s2390_s26 + $0x3d0] sm:$0xff] }
  0xf8   : > { %894 = vst [vmem:[#allocation2 + $0xa8] sm:$0xff] %v830_v46  ;;  %895 = vst [vmem:[#allocation2 + $0x1c8] sm:$0xff] %v831_v23  ;;  %v837_v51 = vadd.f32 %v773_v12, %v2716_v16  ;;  %v775_v52 = vld [vmem:[%s2390_s26 + $0x3d8] sm:$0xff]  ;;  %v776_v31 = vld [vmem:[%s2390_s26 + $0x3e0] sm:$0xff]  ;;  %v838_v50 = vadd.f32 %v774_v24, %v2725_v59 }
  0xf9   : > { %896 = vst [vmem:[#allocation2 + $0x170] sm:$0xff] %v832_v49  ;;  %897 = vst [vmem:[#allocation2 + $0x178] sm:$0xff] %v833_v2  ;;  %v839_v36 = vadd.f32 %v775_v52, %v2734_v53  ;;  %v840_v44 = vadd.f32 %v776_v31, %v2742_v26  ;;  %v777_v0 = vld [vmem:[%s2390_s26 + $0x3e8] sm:$0xff]  ;;  %v778_v3 = vld [vmem:[%s2390_s26 + $0x3f0] sm:$0xff] }
  0xfa   : > { %898 = vst [vmem:[#allocation2 + $0x68] sm:$0xff] %v834_v58  ;;  %v779_v29 = vld [vmem:[%s2390_s26 + $0x3f8] sm:$0xff]  ;;  %899 = vst [vmem:[#allocation2 + $0x190] sm:$0xff] %v835_v15  ;;  %v841_v6 = vadd.f32 %v777_v0, %v585_v28  ;;  %v842_v17 = vadd.f32 %v778_v3, %v586_v20 }
  0xfb   : > { %900 = vst [vmem:[#allocation2 + $0x198] sm:$0xff] %v836_v42  ;;  %901 = vst [vmem:[#allocation2 + $0x38] sm:$0xff] %v837_v51  ;;  %v843_v16 = vadd.f32 %v779_v29, %v587_v14 }
  0xfc   : > { %902 = vst [vmem:[#allocation2 + $0xc0] sm:$0xff] %v838_v50  ;;  %903 = vst [vmem:[#allocation2 + $0x1c0] sm:$0xff] %v839_v36 }
  0xfd   : > { %904 = vst [vmem:[#allocation2 + $0x158] sm:$0xff] %v840_v44  ;;  %905 = vst [vmem:[#allocation2 + $0x10] sm:$0xff] %v841_v6 }
  0xfe   : > { %906 = vst [vmem:[#allocation2 + $0x58] sm:$0xff] %v842_v17  ;;  %907 = vst [vmem:[#allocation2 + $0xa0] sm:$0xff] %v843_v16 }
  0xff PF: > { %p1686_p11 = scmp.ne.s32.totalorder %s2147_s24, 1 }
 0x101   : > { %911 = sbr.rel (%p1686_p11) target bundleno = 922 (0x39a), region = 72 }
 0x106   : > { %v912_v59 = vld [vmem:[#allocation2 + $0xb0] sm:$0xff]  ;;  %v914_v35 = vld [vmem:[#allocation2 + $0xd8] sm:$0xff]  ;;  %v1112_v60 = vlaneseq  ;;  %v917_v33 = vld [vmem:[#allocation2 + $0x168] sm:$0xff]  ;;  %vm2176_vm1 = vmmov 0   ;;  %vm1317_vm2 = vcmask 130112   ;;  %vm1324_vm3 = vcmask 195712  }
 0x107   : > { %v913_v27 = vld [vmem:[#allocation2 + $0x1b0] sm:$0xff]  ;;  %v915_v43 = vld [vmem:[#allocation2 + $0x18] sm:$0xff]  ;;  %v960_v34 = vld [vmem:[%s2390_s26] sm:$0xff]  ;;  %vm1331_vm4 = vcmask 261312   ;;  %vm1338_vm5 = vcmask 326912   ;;  %vm1345_vm6 = vcmask 392512  }
 0x108   : > { %v916_v61 = vld [vmem:[#allocation2 + $0x50] sm:$0xff]  ;;  %v961_v53 = vld [vmem:[%s2390_s26 + $0x8] sm:$0xff]  ;;  %v2790_v41 = vand.u32 127, %v1112_v60  ;;  %v2792_v62 = vshrl.u32 %v1112_v60, 7  ;;  %v963_v63 = vld [vmem:[%s2390_s26 + $0x18] sm:$0xff]  ;;  %v1008_v26 = vadd.f32 %v960_v34, %v912_v59  ;;  %vm1352_vm7 = vcmask 458112  }
 0x109   : > { %v962_v32 = vld [vmem:[%s2390_s26 + $0x10] sm:$0xff]  ;;  %v964_v55 = vld [vmem:[%s2390_s26 + $0x20] sm:$0xff]  ;;  %v965_v7 = vld [vmem:[%s2390_s26 + $0x28] sm:$0xff]  ;;  %v1009_v57 = vadd.f32 %v961_v53, %v913_v27  ;;  %v1011_v8 = vadd.f32 %v963_v63, %v915_v43  ;;  %vm1359_vm8 = vcmask 523712   ;;  %vm1361_vm9 = vcmask 523264  }
 0x10a   : > { %v1010_v22 = vadd.f32 %v962_v32, %v914_v35  ;;  %v1012_v9 = vadd.f32 %v964_v55, %v916_v61  ;;  %v2797_v54 = vadd.f32 %v965_v7, %v917_v33  ;;  %v1104_v10 = vld [vmem:[%s2390_s26 + $0x30] sm:$0xff]  ;;  %vm1122_vm0 = vcmp.lt.s32.totalorder %v2790_v41, 32  ;;  %v924_v11 = vld [vmem:[#allocation2 + $0xe0] sm:$0xff]  ;;  %v925_v38 = vld [vmem:[#allocation2 + $0x188] sm:$0xff] }
 0x10b   : > { %1057 = vst [vmem:[#allocation2 + $0x1b0] sm:$0xff] %v1009_v57  ;;  %v1123_v28 = vsel %vm1122_vm0, %v1104_v10, 0.0  ;;  %v926_v18 = vld [vmem:[#allocation2 + $0x138] sm:$0xff]  ;;  %v1310_v4 = vsub.s32 %v2790_v41, %v2792_v62  ;;  %1059 = vst [vmem:[#allocation2 + $0x18] sm:$0xff] %v1011_v8  ;;  %v927_v37 = vld [vmem:[#allocation2 + $0x140] sm:$0xff]  ;;  %vm1529_vm10 = vcmask 516096  }
 0x10c   : > { %1058 = vst [vmem:[#allocation2 + $0xd8] sm:$0xff] %v1010_v22  ;;  %1060 = vst [vmem:[#allocation2 + $0x50] sm:$0xff] %v1012_v9  ;;  %v1131_v19 = vadd.f32 %v1123_v28, %v1008_v26  ;;  %v928_v20 = vld [vmem:[#allocation2 + $0x80] sm:$0xff]  ;;  %v929_v39 = vld [vmem:[#allocation2 + $0x1a8] sm:$0xff] }
 0x10d   : > { %1061 = vst [vmem:[#allocation2 + $0x168] sm:$0xff] %v2797_v54  ;;  %v972_v40 = vld [vmem:[%s2390_s26 + $0x100] sm:$0xff]  ;;  %v973_v21 = vld [vmem:[%s2390_s26 + $0x108] sm:$0xff]  ;;  %v974_v25 = vld [vmem:[%s2390_s26 + $0x110] sm:$0xff] }
 0x10e   : > { %1139 = vst [vmem:[#allocation2 + $0xb0] sm:$0xff] %v1131_v19  ;;  %v1211_v13 = vadd.f32 %v1131_v19, %v1009_v57  ;;  %v975_v56 = vld [vmem:[%s2390_s26 + $0x118] sm:$0xff]  ;;  %v976_v14 = vld [vmem:[%s2390_s26 + $0x120] sm:$0xff]  ;;  %v977_v45 = vld [vmem:[%s2390_s26 + $0x128] sm:$0xff]  ;;  %v1020_v46 = vadd.f32 %v972_v40, %v924_v11  ;;  %v1021_v23 = vadd.f32 %v973_v21, %v925_v38  ;;  %v1022_v47 = vadd.f32 %v974_v25, %v926_v18 }
 0x10f   : > { %v1023_v30 = vadd.f32 %v975_v56, %v927_v37  ;;  %v2812_v1 = vadd.f32 %v976_v14, %v928_v20  ;;  %v2814_v49 = vadd.f32 %v977_v45, %v929_v39  ;;  %v1106_v2 = vld [vmem:[%s2390_s26 + $0x130] sm:$0xff]  ;;  %v918_v48 = vld [vmem:[#allocation2 + $0x180] sm:$0xff]  ;;  %v920_v15 = vld [vmem:[#allocation2 + $0x118] sm:$0xff] }
 0x110   : > { %v1212_v58 = vadd.f32 %v1211_v13, %v1010_v22  ;;  %1069 = vst [vmem:[#allocation2 + $0x188] sm:$0xff] %v1021_v23  ;;  %1070 = vst [vmem:[#allocation2 + $0x138] sm:$0xff] %v1022_v47  ;;  %v1125_v5 = vsel %vm1122_vm0, %v1106_v2, 0.0  ;;  %v919_v12 = vld [vmem:[#allocation2 + $0x110] sm:$0xff]  ;;  %v921_v51 = vld [vmem:[#allocation2 + $0x98] sm:$0xff] }
 0x111   : > { %1071 = vst [vmem:[#allocation2 + $0x140] sm:$0xff] %v1023_v30  ;;  %1072 = vst [vmem:[#allocation2 + $0x80] sm:$0xff] %v2812_v1  ;;  %v1133_v42 = vadd.f32 %v1125_v5, %v1020_v46  ;;  %v922_v24 = vld [vmem:[#allocation2 + $0x120] sm:$0xff]  ;;  %v923_v52 = vld [vmem:[#allocation2 + $0x150] sm:$0xff] }
 0x112   : > { %1073 = vst [vmem:[#allocation2 + $0x1a8] sm:$0xff] %v2814_v49  ;;  %v1213_v31 = vadd.f32 %v1212_v58, %v1011_v8  ;;  %v966_v50 = vld [vmem:[%s2390_s26 + $0x80] sm:$0xff]  ;;  %v967_v36 = vld [vmem:[%s2390_s26 + $0x88] sm:$0xff]  ;;  %v968_v44 = vld [vmem:[%s2390_s26 + $0x90] sm:$0xff] }
 0x113   : > { %1141 = vst [vmem:[#allocation2 + $0xe0] sm:$0xff] %v1133_v42  ;;  %v1229_v0 = vadd.f32 %v1133_v42, %v1021_v23  ;;  %v969_v3 = vld [vmem:[%s2390_s26 + $0x98] sm:$0xff]  ;;  %v970_v29 = vld [vmem:[%s2390_s26 + $0xa0] sm:$0xff]  ;;  %v971_v6 = vld [vmem:[%s2390_s26 + $0xa8] sm:$0xff]  ;;  %v1014_v17 = vadd.f32 %v966_v50, %v918_v48  ;;  %v1015_v16 = vadd.f32 %v967_v36, %v919_v12  ;;  %v1016_v59 = vadd.f32 %v968_v44, %v920_v15 }
 0x114   : > { %v1153_v27 = vld [vmem:[#allocation2 + $0x130] sm:$0xff]  ;;  %v1214_v35 = vadd.f32 %v1213_v31, %v1012_v9  ;;  %v1017_v60 = vadd.f32 %v969_v3, %v921_v51  ;;  %v2827_v43 = vadd.f32 %v970_v29, %v922_v24  ;;  %v2829_v61 = vadd.f32 %v971_v6, %v923_v52  ;;  %v1154_v34 = vld [vmem:[#allocation2 + $0x48] sm:$0xff]  ;;  %v931_v55 = vld [vmem:[#allocation2 + $0xf8] sm:$0xff] }
 0x115   : > { %v1105_v33 = vld [vmem:[%s2390_s26 + $0xb0] sm:$0xff]  ;;  %v1230_v53 = vadd.f32 %v1229_v0, %v1022_v47  ;;  %1063 = vst [vmem:[#allocation2 + $0x110] sm:$0xff] %v1015_v16  ;;  %1064 = vst [vmem:[#allocation2 + $0x118] sm:$0xff] %v1016_v59  ;;  %v930_v63 = vld [vmem:[#allocation2 + $0x1e8] sm:$0xff] }
 0x116   : > { %v1124_v32 = vsel %vm1122_vm0, %v1105_v33, 0.0  ;;  %v932_v7 = vld [vmem:[#allocation2 + $0x160] sm:$0xff]  ;;  %v1215_v26 = vadd.f32 %v1214_v35, %v2797_v54  ;;  %1065 = vst [vmem:[#allocation2 + $0x98] sm:$0xff] %v1017_v60  ;;  %1066 = vst [vmem:[#allocation2 + $0x120] sm:$0xff] %v2827_v43  ;;  %v933_v22 = vld [vmem:[#allocation2 + $0x30] sm:$0xff] }
 0x117   : > { %1067 = vst [vmem:[#allocation2 + $0x150] sm:$0xff] %v2829_v61  ;;  %v1132_v57 = vadd.f32 %v1124_v32, %v1014_v17  ;;  %v934_v8 = vld [vmem:[#allocation2 + $0x1e0] sm:$0xff]  ;;  %v1231_v10 = vadd.f32 %v1230_v53, %v1023_v30  ;;  %v979_v11 = vld [vmem:[%s2390_s26 + $0x188] sm:$0xff]  ;;  %v980_v38 = vld [vmem:[%s2390_s26 + $0x190] sm:$0xff] }
 0x118   : > { %v935_v9 = vld [vmem:[#allocation2] sm:$0xff]  ;;  %v1216_v18 = vadd.f32 %v1215_v26, %v1153_v27  ;;  %v981_v54 = vld [vmem:[%s2390_s26 + $0x198] sm:$0xff]  ;;  %v983_v20 = vld [vmem:[%s2390_s26 + $0x1a8] sm:$0xff]  ;;  %v1027_v40 = vadd.f32 %v979_v11, %v931_v55  ;;  %v1028_v13 = vadd.f32 %v980_v38, %v932_v7 }
 0x119   : > { %v978_v28 = vld [vmem:[%s2390_s26 + $0x180] sm:$0xff]  ;;  %1140 = vst [vmem:[#allocation2 + $0x180] sm:$0xff] %v1132_v57  ;;  %v1220_v19 = vadd.f32 %v1132_v57, %v1015_v16  ;;  %v1169_v21 = vld [vmem:[#allocation2 + $0x1b8] sm:$0xff]  ;;  %v1232_v25 = vadd.f32 %v1231_v10, %v2812_v1  ;;  %v1029_v56 = vadd.f32 %v981_v54, %v933_v22  ;;  %v1107_v45 = vld [vmem:[%s2390_s26 + $0x1b0] sm:$0xff]  ;;  %v2847_v30 = vadd.f32 %v983_v20, %v935_v9 }
 0x11a   : > { %v982_v37 = vld [vmem:[%s2390_s26 + $0x1a0] sm:$0xff]  ;;  %v1026_v39 = vadd.f32 %v978_v28, %v930_v63  ;;  %v1217_v46 = vadd.f32 %v1216_v18, %v1154_v34  ;;  %v1170_v23 = vld [vmem:[#allocation2 + $0x28] sm:$0xff]  ;;  %1075 = vst [vmem:[#allocation2 + $0xf8] sm:$0xff] %v1027_v40  ;;  %v1126_v2 = vsel %vm1122_vm0, %v1107_v45, 0.0  ;;  %v937_v5 = vld [vmem:[#allocation2 + $0x1d0] sm:$0xff] }
 0x11b   : > { %v2844_v14 = vadd.f32 %v982_v37, %v934_v8  ;;  %v1221_v47 = vadd.f32 %v1220_v19, %v1016_v59  ;;  %v936_v58 = vld [vmem:[#allocation2 + $0x148] sm:$0xff]  ;;  %v938_v1 = vld [vmem:[#allocation2 + $0x100] sm:$0xff]  ;;  %v1233_v48 = vadd.f32 %v1232_v25, %v2814_v49  ;;  %1076 = vst [vmem:[#allocation2 + $0x160] sm:$0xff] %v1028_v13  ;;  %1077 = vst [vmem:[#allocation2 + $0x30] sm:$0xff] %v1029_v56 }
 0x11c   : > { %v1134_v12 = vadd.f32 %v1126_v2, %v1026_v39  ;;  %v939_v15 = vld [vmem:[#allocation2 + $0xc8] sm:$0xff]  ;;  %v940_v42 = vld [vmem:[#allocation2 + $0x40] sm:$0xff]  ;;  %v941_v51 = vld [vmem:[#allocation2 + $0x1f8] sm:$0xff]  ;;  %1218 = vadd.xlane.f32.xlu0 %v1217_v46  ;;  %1079 = vst [vmem:[#allocation2] sm:$0xff] %v2847_v30 }
 0x11d   : > { %1078 = vst [vmem:[#allocation2 + $0x1e0] sm:$0xff] %v2844_v14  ;;  %v1222_v24 = vadd.f32 %v1221_v47, %v1017_v60  ;;  %v984_v52 = vld [vmem:[%s2390_s26 + $0x200] sm:$0xff]  ;;  %v985_v31 = vld [vmem:[%s2390_s26 + $0x208] sm:$0xff]  ;;  %v986_v50 = vld [vmem:[%s2390_s26 + $0x210] sm:$0xff]  ;;  %v1234_v49 = vadd.f32 %v1233_v48, %v1169_v21 }
 0x11e   : > { %1142 = vst [vmem:[#allocation2 + $0x1e8] sm:$0xff] %v1134_v12  ;;  %v1238_v36 = vadd.f32 %v1134_v12, %v1027_v40  ;;  %v987_v44 = vld [vmem:[%s2390_s26 + $0x218] sm:$0xff]  ;;  %v988_v0 = vld [vmem:[%s2390_s26 + $0x220] sm:$0xff]  ;;  %v989_v3 = vld [vmem:[%s2390_s26 + $0x228] sm:$0xff]  ;;  %v1032_v29 = vadd.f32 %v984_v52, %v936_v58  ;;  %v1033_v6 = vadd.f32 %v985_v31, %v937_v5  ;;  %v1034_v59 = vadd.f32 %v986_v50, %v938_v1 }
 0x11f   : > { %v1161_v17 = vld [vmem:[#allocation2 + $0x108] sm:$0xff]  ;;  %v1223_v16 = vadd.f32 %v1222_v24, %v2827_v43  ;;  %v1035_v27 = vadd.f32 %v987_v44, %v939_v15  ;;  %v2861_v35 = vadd.f32 %v988_v0, %v940_v42  ;;  %v1108_v60 = vld [vmem:[%s2390_s26 + $0x230] sm:$0xff]  ;;  %v1235_v33 = vadd.f32 %v1234_v49, %v1170_v23  ;;  %v1162_v34 = vld [vmem:[#allocation2 + $0x60] sm:$0xff] }
 0x120   : > { %v1239_v53 = vadd.f32 %v1238_v36, %v1028_v13  ;;  %v2864_v32 = vadd.f32 %v989_v3, %v941_v51  ;;  %1081 = vst [vmem:[#allocation2 + $0x1d0] sm:$0xff] %v1033_v6  ;;  %v1127_v63 = vsel %vm1122_vm0, %v1108_v60, 0.0  ;;  %v942_v55 = vld [vmem:[#allocation2 + $0x1a0] sm:$0xff]  ;;  %v943_v7 = vld [vmem:[#allocation2 + $0x1f0] sm:$0xff]  ;;  %v944_v43 = vld [vmem:[#allocation2 + $0xe8] sm:$0xff] }
 0x121   : > { %v1224_v26 = vadd.f32 %v1223_v16, %v2829_v61  ;;  %1082 = vst [vmem:[#allocation2 + $0x100] sm:$0xff] %v1034_v59  ;;  %1083 = vst [vmem:[#allocation2 + $0xc8] sm:$0xff] %v1035_v27  ;;  %v1135_v57 = vadd.f32 %v1127_v63, %v1032_v29  ;;  %v945_v22 = vld [vmem:[#allocation2 + $0x78] sm:$0xff]  ;;  %v946_v8 = vld [vmem:[#allocation2 + $0x70] sm:$0xff]  ;;  %1236 = vadd.xlane.f32.xlu1 %v1235_v33 }
 0x122   : > { %1084 = vst [vmem:[#allocation2 + $0x40] sm:$0xff] %v2861_v35  ;;  %v947_v9 = vld [vmem:[#allocation2 + $0x90] sm:$0xff]  ;;  %v1240_v10 = vadd.f32 %v1239_v53, %v1029_v56  ;;  %1085 = vst [vmem:[#allocation2 + $0x1f8] sm:$0xff] %v2864_v32  ;;  %v990_v28 = vld [vmem:[%s2390_s26 + $0x280] sm:$0xff] }
 0x123   : > { %v991_v11 = vld [vmem:[%s2390_s26 + $0x288] sm:$0xff]  ;;  %v992_v38 = vld [vmem:[%s2390_s26 + $0x290] sm:$0xff]  ;;  %v1225_v61 = vadd.f32 %v1224_v26, %v1161_v17  ;;  %1143 = vst [vmem:[#allocation2 + $0x148] sm:$0xff] %v1135_v57  ;;  %v1247_v18 = vadd.f32 %v1135_v57, %v1033_v6  ;;  %v993_v19 = vld [vmem:[%s2390_s26 + $0x298] sm:$0xff]  ;;  %v1038_v20 = vadd.f32 %v990_v28, %v942_v55 }
 0x124   : > { %v994_v54 = vld [vmem:[%s2390_s26 + $0x2a0] sm:$0xff]  ;;  %v995_v37 = vld [vmem:[%s2390_s26 + $0x2a8] sm:$0xff]  ;;  %v1039_v39 = vadd.f32 %v991_v11, %v943_v7  ;;  %v1177_v40 = vld [vmem:[#allocation2 + $0xf0] sm:$0xff]  ;;  %v1241_v21 = vadd.f32 %v1240_v10, %v2844_v14  ;;  %v1040_v25 = vadd.f32 %v992_v38, %v944_v43  ;;  %v1041_v13 = vadd.f32 %v993_v19, %v945_v22 }
 0x125   : > { %v2878_v56 = vadd.f32 %v994_v54, %v946_v8  ;;  %v1109_v45 = vld [vmem:[%s2390_s26 + $0x2b0] sm:$0xff]  ;;  %v1226_v46 = vadd.f32 %v1225_v61, %v1162_v34  ;;  %v1178_v23 = vld [vmem:[#allocation2 + $0x8] sm:$0xff]  ;;  %v1248_v47 = vadd.f32 %v1247_v18, %v1034_v59  ;;  %v2881_v2 = vadd.f32 %v995_v37, %v947_v9  ;;  %v948_v5 = vld [vmem:[#allocation2 + $0xb8] sm:$0xff] }
 0x126   : > { %1087 = vst [vmem:[#allocation2 + $0x1f0] sm:$0xff] %v1039_v39  ;;  %v1128_v58 = vsel %vm1122_vm0, %v1109_v45, 0.0  ;;  %v949_v1 = vld [vmem:[#allocation2 + $0x88] sm:$0xff]  ;;  %v1242_v48 = vadd.f32 %v1241_v21, %v2847_v30  ;;  %1088 = vst [vmem:[#allocation2 + $0xe8] sm:$0xff] %v1040_v25  ;;  %v952_v42 = vld [vmem:[#allocation2 + $0x170] sm:$0xff] }
 0x127   : > { %v950_v14 = vld [vmem:[#allocation2 + $0xa8] sm:$0xff]  ;;  %1089 = vst [vmem:[#allocation2 + $0x78] sm:$0xff] %v1041_v13  ;;  %1090 = vst [vmem:[#allocation2 + $0x70] sm:$0xff] %v2878_v56  ;;  %v1136_v12 = vadd.f32 %v1128_v58, %v1038_v20  ;;  %v953_v51 = vld [vmem:[#allocation2 + $0x178] sm:$0xff]  ;;  %1227 = vadd.xlane.f32.xlu0 %v1226_v46  ;;  %v1249_v24 = vadd.f32 %v1248_v47, %v1035_v27 }
 0x128   : > { %v951_v15 = vld [vmem:[#allocation2 + $0x1c8] sm:$0xff]  ;;  %1091 = vst [vmem:[#allocation2 + $0x90] sm:$0xff] %v2881_v2  ;;  %v996_v52 = vld [vmem:[%s2390_s26 + $0x300] sm:$0xff]  ;;  %v998_v50 = vld [vmem:[%s2390_s26 + $0x310] sm:$0xff]  ;;  %v1243_v30 = vadd.f32 %v1242_v48, %v1177_v40 }
 0x129   : > { %v997_v31 = vld [vmem:[%s2390_s26 + $0x308] sm:$0xff]  ;;  %1144 = vst [vmem:[#allocation2 + $0x1a0] sm:$0xff] %v1136_v12  ;;  %v1256_v49 = vadd.f32 %v1136_v12, %v1039_v39  ;;  %v999_v36 = vld [vmem:[%s2390_s26 + $0x318] sm:$0xff]  ;;  %v1000_v44 = vld [vmem:[%s2390_s26 + $0x320] sm:$0xff]  ;;  %v1044_v3 = vadd.f32 %v996_v52, %v948_v5  ;;  %v1250_v17 = vadd.f32 %v1249_v24, %v2861_v35  ;;  %v1046_v16 = vadd.f32 %v998_v50, %v950_v14 }
 0x12a   : > { %v1001_v0 = vld [vmem:[%s2390_s26 + $0x328] sm:$0xff]  ;;  %v1045_v29 = vadd.f32 %v997_v31, %v949_v1  ;;  %v1185_v6 = vld [vmem:[#allocation2 + $0x20] sm:$0xff]  ;;  %v1047_v59 = vadd.f32 %v999_v36, %v951_v15  ;;  %v2895_v27 = vadd.f32 %v1000_v44, %v952_v42  ;;  %v1110_v60 = vld [vmem:[%s2390_s26 + $0x330] sm:$0xff]  ;;  %v1244_v33 = vadd.f32 %v1243_v30, %v1178_v23 }
 0x12b   : > { %v1186_v34 = vld [vmem:[#allocation2 + $0x128] sm:$0xff]  ;;  %v1257_v53 = vadd.f32 %v1256_v49, %v1040_v25  ;;  %v2898_v63 = vadd.f32 %v1001_v0, %v953_v51  ;;  %v1129_v55 = vsel %vm1122_vm0, %v1110_v60, 0.0  ;;  %v954_v7 = vld [vmem:[#allocation2 + $0x198] sm:$0xff]  ;;  %v956_v35 = vld [vmem:[#allocation2 + $0xc0] sm:$0xff]  ;;  %v1251_v26 = vadd.f32 %v1250_v17, %v2864_v32  ;;  %1094 = vst [vmem:[#allocation2 + $0xa8] sm:$0xff] %v1046_v16 }
 0x12c   : > { %1093 = vst [vmem:[#allocation2 + $0x88] sm:$0xff] %v1045_v29  ;;  %v955_v43 = vld [vmem:[#allocation2 + $0x38] sm:$0xff]  ;;  %1095 = vst [vmem:[#allocation2 + $0x1c8] sm:$0xff] %v1047_v59  ;;  %v1137_v57 = vadd.f32 %v1129_v55, %v1044_v3  ;;  %v957_v22 = vld [vmem:[#allocation2 + $0x1c0] sm:$0xff]  ;;  %1245 = vadd.xlane.f32.xlu1 %v1244_v33  ;;  %v2909_v32 = vadd.s32 4294967280, %v2790_v41  ;;  %v2175_v42 = vmov 0.0  }
 0x12d   : > { %1096 = vst [vmem:[#allocation2 + $0x170] sm:$0xff] %v2895_v27  ;;  %v958_v8 = vld [vmem:[#allocation2 + $0x158] sm:$0xff]  ;;  %v959_v9 = vld [vmem:[#allocation2 + $0x10] sm:$0xff]  ;;  %v1258_v10 = vadd.f32 %v1257_v53, %v1041_v13  ;;  %1097 = vst [vmem:[#allocation2 + $0x178] sm:$0xff] %v2898_v63  ;;  %v1252_v61 = vadd.f32 %v1251_v26, %v1185_v6  ;;  %1714 = vmatprep.subr.mxu0 %v2175_v42  ;;  %v2923_v51 = vadd.s32 4294967288, %v2790_v41  ;;  %1733 = vmatprep.subr.mxu1 %v2175_v42 }
 0x12e   : > { %v1002_v28 = vld [vmem:[%s2390_s26 + $0x380] sm:$0xff]  ;;  %v1003_v11 = vld [vmem:[%s2390_s26 + $0x388] sm:$0xff]  ;;  %v1004_v38 = vld [vmem:[%s2390_s26 + $0x390] sm:$0xff]  ;;  %1145 = vst [vmem:[#allocation2 + $0xb8] sm:$0xff] %v1137_v57  ;;  %v1265_v18 = vadd.f32 %v1137_v57, %v1045_v29  ;;  %v2932_v44 = vadd.s32 4294967272, %v2790_v41  ;;  %1730 = vmatprep.mubr.msk.f32.mxu0 %vm2176_vm1, %v2175_v42  ;;  %1749 = vmatprep.mubr.msk.f32.mxu1 %vm2176_vm1, %v2175_v42 }
 0x12f   : > { %v1005_v19 = vld [vmem:[%s2390_s26 + $0x398] sm:$0xff]  ;;  %v1006_v54 = vld [vmem:[%s2390_s26 + $0x3a0] sm:$0xff]  ;;  %v1007_v37 = vld [vmem:[%s2390_s26 + $0x3a8] sm:$0xff]  ;;  %v1050_v20 = vadd.f32 %v1002_v28, %v954_v7  ;;  %v1051_v39 = vadd.f32 %v1003_v11, %v955_v43  ;;  %v1259_v40 = vadd.f32 %v1258_v10, %v2878_v56  ;;  %v1052_v21 = vadd.f32 %v1004_v38, %v956_v35 }
 0x130   : > { %v1053_v25 = vadd.f32 %v1005_v19, %v957_v22  ;;  %v1054_v13 = vadd.f32 %v1006_v54, %v958_v8  ;;  %v1111_v45 = vld [vmem:[%s2390_s26 + $0x3b0] sm:$0xff]  ;;  %v1253_v46 = vadd.f32 %v1252_v61, %v1186_v34  ;;  %v1193_v23 = vld [vmem:[#allocation2 + $0x1d8] sm:$0xff]  ;;  %v1266_v47 = vadd.f32 %v1265_v18, %v1046_v16  ;;  %v1201_v30 = vld [vmem:[#allocation2 + $0x68] sm:$0xff] }
 0x131   : > { %v1055_v58 = vadd.f32 %v1007_v37, %v959_v9  ;;  %1099 = vst [vmem:[#allocation2 + $0x38] sm:$0xff] %v1051_v39  ;;  %v1130_v5 = vsel %vm1122_vm0, %v1111_v45, 0.0  ;;  %v1298_v1 = vld [vmem:[#allocation6 + $0x38] sm:$0xff]  ;;  %v1260_v14 = vadd.f32 %v1259_v40, %v2881_v2  ;;  %1100 = vst [vmem:[#allocation2 + $0xc0] sm:$0xff] %v1052_v21  ;;  %v1322_v56 = vsub.s32 %v2909_v32, %v2792_v62  ;;  %v1194_v12 = vld [vmem:[#allocation2 + $0xd0] sm:$0xff] }
 0x132   : > { %1101 = vst [vmem:[#allocation2 + $0x1c0] sm:$0xff] %v1053_v25  ;;  %1102 = vst [vmem:[#allocation2 + $0x158] sm:$0xff] %v1054_v13  ;;  %v1138_v48 = vadd.f32 %v1130_v5, %v1050_v20  ;;  %1254 = vadd.xlane.f32.xlu0 %v1253_v46  ;;  %v1267_v15 = vadd.f32 %v1266_v47, %v1047_v59  ;;  %1715 = vmatpush3.msra.mxu0 %v1298_v1  ;;  %v1202_v0 = vld [vmem:[#allocation2 + $0x190] sm:$0xff]  ;;  %v1209_v59 = vld [vmem:[#allocation2 + $0x58] sm:$0xff]  ;;  %v1333_v34 = vadd.s32 4294967264, %v2790_v41 }
 0x133   : > { %1103 = vst [vmem:[#allocation2 + $0x10] sm:$0xff] %v1055_v58  ;;  %v1261_v24 = vadd.f32 %v1260_v14, %v1193_v23  ;;  %v1315_v31 = vsub.s32 %v2923_v51, %v2792_v62  ;;  %1716 = vmatprep.subr.mxu0 %v2175_v42  ;;  %v1329_v6 = vsub.s32 %v2932_v44, %v2792_v62  ;;  %v1297_v60 = vld [vmem:[#allocation6 + $0x30] sm:$0xff]  ;;  %v1296_v33 = vld [vmem:[#allocation6 + $0x28] sm:$0xff]  ;;  %v1210_v53 = vld [vmem:[#allocation2 + $0xa0] sm:$0xff]  ;;  %v1340_v43 = vadd.s32 4294967256, %v2790_v41 }
 0x134   : > { %1146 = vst [vmem:[#allocation2 + $0x198] sm:$0xff] %v1138_v48  ;;  %v1274_v2 = vadd.f32 %v1138_v48, %v1051_v39  ;;  %v1268_v52 = vadd.f32 %v1267_v15, %v2895_v27  ;;  %1717 = vmatpush3.msra.mxu0 %v1297_v60  ;;  %v1336_v55 = vsub.s32 %v1333_v34, %v2792_v62  ;;  %v1295_v26 = vld [vmem:[#allocation6 + $0x20] sm:$0xff]  ;;  %v1294_v57 = vld [vmem:[#allocation6 + $0x18] sm:$0xff]  ;;  %v1347_v22 = vadd.s32 4294967248, %v2790_v41  ;;  %v1293_v28 = vld [vmem:[#allocation6 + $0x10] sm:$0xff] }
 0x135   : > { %v1262_v50 = vadd.f32 %v1261_v24, %v1194_v12  ;;  %1718 = vmatprep.subr.mxu0 %v2175_v42  ;;  %v1343_v35 = vsub.s32 %v1340_v43, %v2792_v62  ;;  %v1354_v9 = vadd.s32 4294967240, %v2790_v41  ;;  %v1292_v11 = vld [vmem:[#allocation6 + $0x8] sm:$0xff]  ;;  %v1291_v38 = vld [vmem:[#allocation6] sm:$0xff]  ;;  %v1443_v44 = vld [vmem:[#allocation9 + $0x10] sm:$0xff] }
 0x136   : > { %v1275_v49 = vadd.f32 %v1274_v2, %v1052_v21  ;;  %v1269_v36 = vadd.f32 %v1268_v52, %v2898_v63  ;;  %1719 = vmatpush3.msra.mxu0 %v1296_v33  ;;  %v1350_v8 = vsub.s32 %v1347_v22, %v2792_v62 }
 0x137   : > { %1263 = vadd.xlane.f32.xlu1 %v1262_v50  ;;  %1720 = vmatprep.subr.mxu0 %v2175_v42  ;;  %v1357_v10 = vsub.s32 %v1354_v9, %v2792_v62  ;;  %v1447_v50 = vld [vmem:[#allocation9 + $0x30] sm:$0xff] }
 0x138   : > { %v1276_v3 = vadd.f32 %v1275_v49, %v1053_v25  ;;  %v1270_v29 = vadd.f32 %v1269_v36, %v1201_v30  ;;  %1721 = vmatpush3.msra.mxu0 %v1295_v26  ;;  %v1446_v30 = vld [vmem:[#allocation9 + $0x28] sm:$0xff]  ;;  %v1445_v49 = vld [vmem:[#allocation9 + $0x20] sm:$0xff]  ;;  %v1444_v36 = vld [vmem:[#allocation9 + $0x18] sm:$0xff] }
 0x139   : > { %1722 = vmatprep.subr.mxu0 %v2175_v42 }
 0x13a   : > { %v1277_v17 = vadd.f32 %v1276_v3, %v1054_v13  ;;  %v1271_v16 = vadd.f32 %v1270_v29, %v1202_v0  ;;  %1723 = vmatpush3.msra.mxu0 %v1294_v57  ;;  %v1442_v0 = vld [vmem:[#allocation9 + $0x8] sm:$0xff]  ;;  %v1441_v3 = vld [vmem:[#allocation9] sm:$0xff]  ;;  %v1299_v29 = vld [vmem:[#allocation8] sm:$0x1] }
 0x13b   : > { %1724 = vmatprep.subr.mxu0 %v2175_v42 }
 0x13c   : > { %v1278_v27 = vadd.f32 %v1277_v17, %v1055_v58  ;;  %1272 = vadd.xlane.f32.xlu0 %v1271_v16  ;;  %1725 = vmatpush3.msra.mxu0 %v1293_v28 }
 0x13d   : > { %1726 = vmatprep.subr.mxu0 %v2175_v42 }
 0x13e   : > { %v1279_v63 = vadd.f32 %v1278_v27, %v1209_v59  ;;  %1727 = vmatpush3.msra.mxu0 %v1292_v11 }
 0x13f   : > { %1728 = vmatprep.subr.mxu0 %v2175_v42 }
 0x140   : > { %v1280_v7 = vadd.f32 %v1279_v63, %v1210_v53  ;;  %1729 = vmatpush3.msra.mxu0 %v1291_v38  ;;  %v1449_v53 = vld [vmem:[#allocation11] sm:$0x1] }
 0x142   : > { %1281 = vadd.xlane.f32.xlu1 %v1280_v7 }
 0x1a5   : > { %v1219_v61 = vpop.xlane.xlu0 %1218 }
 0x1a6   : > { %v1283_v19 = vmul.f32 0.0003511236, %v1219_v61 }
 0x1a8   : > { %v1311_v39 = vrot.slane %v1283_v19, %v1310_v4 }
 0x1aa   : > { %v1237_v18 = vpop.xlane.xlu1 %1236 }
 0x1ab   : > { %v1285_v54 = vmul.f32 0.0003511236, %v1237_v18 }
 0x1ad   : > { %v1323_v21 = vrot.slane %v1285_v54, %v1322_v56 }
 0x1b0   : > { %v1228_v37 = vpop.xlane.xlu0 %1227 }
 0x1b1   : > { %v1284_v20 = vmul.f32 0.0003511236, %v1228_v37 }
 0x1b3   : > { %v1316_v40 = vrot.slane %v1284_v20, %v1315_v31  ;;  %v1448_v31 = vld [vmem:[#allocation9 + $0x38] sm:$0xff] }
 0x1b4   : > { %1734 = vmatpush3.msra.mxu1 %v1448_v31 }
 0x1b5   : > { %v1318_v25 = vsel %vm1317_vm2, %v1316_v40, %v1311_v39  ;;  %v1246_v13 = vpop.xlane.xlu1 %1245  ;;  %1735 = vmatprep.subr.mxu1 %v2175_v42 }
 0x1b6   : > { %v1286_v45 = vmul.f32 0.0003511236, %v1246_v13  ;;  %v1325_v46 = vsel %vm1324_vm3, %v1323_v21, %v1318_v25  ;;  %1736 = vmatpush3.msra.mxu1 %v1447_v50 }
 0x1b7   : > { %1737 = vmatprep.subr.mxu1 %v2175_v42 }
 0x1b8   : > { %v1330_v23 = vrot.slane %v1286_v45, %v1329_v6  ;;  %1738 = vmatpush3.msra.mxu1 %v1446_v30 }
 0x1b9   : > { %1739 = vmatprep.subr.mxu1 %v2175_v42 }
 0x1ba   : > { %v1332_v47 = vsel %vm1331_vm4, %v1330_v23, %v1325_v46  ;;  %1740 = vmatpush3.msra.mxu1 %v1445_v49 }
 0x1bb   : > { %v1255_v58 = vpop.xlane.xlu0 %1254  ;;  %1741 = vmatprep.subr.mxu1 %v2175_v42 }
 0x1bc   : > { %v1287_v5 = vmul.f32 0.0003511236, %v1255_v58  ;;  %1742 = vmatpush3.msra.mxu1 %v1444_v36 }
 0x1bd   : > { %1743 = vmatprep.subr.mxu1 %v2175_v42 }
 0x1be   : > { %v1337_v1 = vrot.slane %v1287_v5, %v1336_v55  ;;  %1744 = vmatpush3.msra.mxu1 %v1443_v44 }
 0x1bf   : > { %1745 = vmatprep.subr.mxu1 %v2175_v42 }
 0x1c0   : > { %v1339_v14 = vsel %vm1338_vm5, %v1337_v1, %v1332_v47  ;;  %v1264_v41 = vpop.xlane.xlu1 %1263  ;;  %1746 = vmatpush3.msra.mxu1 %v1442_v0 }
 0x1c1   : > { %v1288_v4 = vmul.f32 0.0003511236, %v1264_v41  ;;  %1747 = vmatprep.subr.mxu1 %v2175_v42 }
 0x1c2   : > { %1748 = vmatpush3.msra.mxu1 %v1441_v3 }
 0x1c3   : > { %v1344_v48 = vrot.slane %v1288_v4, %v1343_v35 }
 0x1c5   : > { %v1346_v12 = vsel %vm1345_vm6, %v1344_v48, %v1339_v14  ;;  %v1273_v15 = vpop.xlane.xlu0 %1272 }
 0x1c6   : > { %v1289_v62 = vmul.f32 0.0003511236, %v1273_v15 }
 0x1c8   : > { %v1351_v32 = vrot.slane %v1289_v62, %v1350_v8 }
 0x1ca   : > { %v1353_v51 = vsel %vm1352_vm7, %v1351_v32, %v1346_v12 }
 0x1cb   : > { %v1282_v56 = vpop.xlane.xlu1 %1281 }
 0x1cc   : > { %v1290_v24 = vmul.f32 0.0003511236, %v1282_v56 }
 0x1ce   : > { %v1358_v2 = vrot.slane %v1290_v24, %v1357_v10 }
 0x1d0   : > { %v1360_v52 = vsel %vm1359_vm8, %v1358_v2, %v1353_v51 }
 0x1d1   : > { %1731 = vmatmul.mubr.msk.f32.vlgmr.msra.gmra.mxu0 %vm1361_vm9, %v1360_v52 }
 0x291   : > { %v1430_v6 = vpop.f32.mrf.mxu0 }
 0x292   : > { %v1431_v17 = vadd.f32 %v1430_v6, %v1299_v29 }
 0x293   : > { %v1732_v16 = vpop.f32.mrf.mxu0 }
 0x294   : > { %v1688_v59 = vmul.f32 -1.442695, %v1431_v17 }
 0x296   : > { %1897 = vpow2.f32 %v1688_v59 }
 0x2a3   : > { %v1898_v27 = vpop.eup %1897 }
 0x2a4   : > { %v1437_v60 = vadd.f32 1.0, %v1898_v27 }
 0x2a6   : > { %1899 = vrcp.f32 %v1437_v60 }
 0x2b3   : > { %v1900_v33 = vpop.eup %1899 }
 0x2b4   : > { %v1440_v34 = vmul.f32 %v1900_v33, %v1431_v17 }
 0x2b6   : > { %1750 = vmatmul.mubr.msk.f32.vlgmr.msra.gmra.mxu1 %vm1361_vm9, %v1440_v34 }
 0x376   : > { %v1519_v63 = vpop.f32.mrf.mxu1 }
 0x377   : > { %v1520_v55 = vadd.f32 %v1519_v63, %v1449_v53 }
 0x378   : > { %v1751_v42 = vpop.f32.mrf.mxu1 }
 0x379   : > { %v1690_v7 = vmul.f32 -1.442695, %v1520_v55 }
 0x37b   : > { %1901 = vpow2.f32 %v1690_v7 }
 0x388   : > { %v1902_v43 = vpop.eup %1901 }
 0x389   : > { %v1526_v35 = vadd.f32 1.0, %v1902_v43 }
 0x38b   : > { %1903 = vrcp.f32 %v1526_v35 }
 0x398   : > { %v1904_v26 = vpop.eup %1903 }
 0x399   : > { %1530 = vst.msk [vmem:[%s2407_s15] sm:$0x1] %vm1529_vm10, %v1904_v26 }
 0x39a PF: > { %s1691_s24 = sshll.u32 %s2151_s25, 4  ;;  %s1544_s12 = sshll.u32 %s2407_s15, 4  ;;  %s1545_s12 = int_to_ptr.vmem [resolvable:$true] %s1544_s12 }
 0x39b   : > { %s1542_s8 = scalar_lea.hbm %s3029_s5, %s1691_s24  ;;  %s1532_s9 = scalar_lea.sflag [#allocation5], %s317_s29 }
 0x39c   : > { %s2035_s10 = scalar_lea.vmem %s1545_s12, 16  ;;  %p3085_p3 = scmp.ne.s32.totalorder %s3050_s16, 0 }
 0x39d   : > { %p2036_p10 = scmp.ne.s32.totalorder %s1545_s12, %s2035_s10  ;;  %s2177_s30 = smov [#allocation12]  }
 0x39e   : > { %s2039_s21 = sshll.u32 %s2177_s30, 4  ;;  %s2040_s21 = int_to_ptr.vmem [resolvable:$false] %s2039_s21 }
 0x39f   : > { %p2037_p9 = pnand %p2036_p10, %p3085_p3  ;;  %s2041_s17 = scalar_lea.vmem %s2040_s21, 32 }
 0x3a0   : > { %p2042_p7 = scmp.lt.s32.totalorder %s1545_s12, %s2040_s21  ;;  %p2043_p13 = scmp.lt.s32.totalorder %s2041_s17, %s2035_s10 }
 0x3a1   : > { %p2038_p6 = pneg %p2037_p9 }
 0x3a2   : > { %p2044_p1 = por %p2043_p13, %p2042_p7 }
 0x3a4   : > { %p2045_p0 = pnand %p2044_p1, %p2038_p6 }
 0x3a6   : > { %2048 = shalt.err (!%p2045_p0)
}
 0x3a7   : > { %s2049_s25 = scalar_lea.hbm %s1542_s8, 16  ;;  %s2053_s6 = scalar_lea.hbm %s3029_s5, 32 }
 0x3a8   : > { %p2050_p4 = scmp.ne.s32.totalorder %s1542_s8, %s2049_s25  ;;  %p2054_p5 = scmp.lt.s32.totalorder %s1542_s8, %s3029_s5 }
 0x3a9   : > { %p2055_p8 = scmp.lt.s32.totalorder %s2053_s6, %s2049_s25 }
 0x3aa   : > { %p2051_p2 = pnand %p2050_p4, %p3085_p3 }
 0x3ab   : > { %p2056_p11 = por %p2055_p8, %p2054_p5 }
 0x3ac   : > { %p2052_p12 = pneg %p2051_p2 }
 0x3ae   : > { %p2057_p10 = pnand %p2056_p11, %p2052_p12 }
 0x3b0   : > { %2060 = shalt.err (!%p2057_p10)
}
 0x3b1   : > { %1770 = dma.vmem_to_hbm [thread:$0]  (%p3085_p3), %s1545_s12, 16, %s1542_s8, %s1532_s9  }
 0x3b2 PF: > { %s3086_s1 = sld [smem:[#allocation23_spill]]  ;;  %p1797_p9 = scmp.ge.s32.totalorder %s2163_s28, 2 }
 0x3b3   : > { %s1556_s3 = sand.u32 1, %s2123_s18  }
 0x3b4   : > { %s1557_s4 = scalar_lea.sflag [#allocation5], %s1556_s3 }
 0x3b8   : > { %p3087_p6 = scmp.ne.s32.totalorder %s3086_s1, 0 }
 0x3ba   : > { %p1786_p7 = pnand %p1797_p9, %p3087_p6 }
 0x3bc   : > { %p1787_p13 = pneg %p1786_p7 }
 0x3be   : > { %2118 = dma.done.wait (%p1787_p13), %s1557_s4, 16  }
 0x3bf   : > { %2120 = vsyncadd (%p1787_p13), %s1557_s4, 4294967280  ;;  %s23_s28 = sadd.s32 1, %s2163_s28   ;;  %s3088_s26 = sld [smem:[#allocation17_spill]] }
 0x3c0   : > { %p20_p1 = scmp.ge.s32.totalorder %s23_s28, 6   ;;  %s3089_s20 = sld [smem:[#allocation21_spill]] }
 0x3c1   : > { %s3090_s16 = sld [smem:[#allocation22_spill]]  ;;  %s3094_s18 = smov %s2127_s19 }
 0x3c2   : > { %s3091_s24 = sld [smem:[#allocation18_spill]]  ;;  %s3096_s21 = smov %s2139_s22 }
 0x3c3   : > { %s3092_s29 = sld [smem:[#allocation19_spill]]  ;;  %s3097_s22 = smov %s2143_s23 }
 0x3c4   : > { %s3093_s15 = sld [smem:[#allocation20_spill]]  ;;  %s3099_s25 = smov %s2159_s27 }
 0x3c5   : > { %s3095_s19 = smov %s3088_s26 }
 0x3c6   :  { %22 = sbr.rel (!%p20_p1) target bundleno = 16 (0x10), region = 113 }
 0x3c7   : > { %s3098_s23 = smov %s3090_s16 }
 0x3c9   : > { %s3100_s26 = smov %s3092_s29 }
 0x3ca   : > { %s3101_s27 = smov %s3093_s15 }
 0x3cb   :  { %1561 = vsyncpa [#allocation4], 1 }
 0x3cc   :  { %1563 = vsyncpa [#allocation4 + $0x1], 1 }
 0x3cd   :  { %1564 = vsyncpa [#allocation7], 1 }
 0x3ce   :  { %1565 = vsyncpa [#allocation10], 1 }
 0x3cf   :  { %1566 = vsyncpa [#allocation5], 1 }
 0x3d0   :  { %1568 = vsyncpa [#allocation5 + $0x1], 1 }

</bundles_post_ra>
